<compile_context>
chip_gen: v6e
topology: v6e:2x2x1
jax: 0.10.0
libtpu: 0.0.40
codegen_flags: <defaults>
</compile_context>

<pallas_src>
import jax
import jax.numpy as jnp
from jax import lax
from jax.experimental import pallas as pl
from jax.experimental.pallas import tpu as pltpu


# --------------------------------------------------------------------------
# Pure-JAX glue helpers (data re-arrangement only, no heavy compute)
# --------------------------------------------------------------------------

def grid_sample_nearest_zeros(inp, grid):
    """F.grid_sample(mode='nearest', padding_mode='zeros', align_corners=True).

    inp : (B, C, H, W), grid : (B, H, W, 2) with coords normalized to [-1, 1].
    """
    B, C, H, W = inp.shape
    gx = (grid[..., 0] + 1.0) * 0.5 * (W - 1)
    gy = (grid[..., 1] + 1.0) * 0.5 * (H - 1)
    ix = jnp.round(gx).astype(jnp.int32)
    iy = jnp.round(gy).astype(jnp.int32)
    valid = (ix >= 0) & (ix < W) & (iy >= 0) & (iy < H)
    ixc = jnp.clip(ix, 0, W - 1)
    iyc = jnp.clip(iy, 0, H - 1)
    b = jnp.arange(B)[:, None, None]
    g = inp[b, :, iyc, ixc]                       # (B, H, W, C)
    g = jnp.where(valid[..., None], g, 0.0)
    return jnp.transpose(g, (0, 3, 1, 2))         # (B, C, H, W)


def unfold_s(x, s):
    """F.unfold(kernel=(s,s), stride=s):  (n,c,h,w) -> (n, c*s*s, (h//s)*(w//s))."""
    n, c, h, w = x.shape
    H, W = h // s, w // s
    x = x.reshape(n, c, H, s, W, s)
    x = jnp.transpose(x, (0, 1, 3, 5, 2, 4))      # n, c, s, s, H, W
    return x.reshape(n, c * s * s, H * W)


def fold_s(x, s, c, h, w):
    """F.fold(output=(h,w), kernel=(s,s), stride=s): inverse of unfold_s."""
    n = x.shape[0]
    H, W = h // s, w // s
    x = x.reshape(n, c, s, s, H, W)
    x = jnp.transpose(x, (0, 1, 4, 2, 5, 3))      # n, c, H, s, W, s
    return x.reshape(n, c, h, w)


# --------------------------------------------------------------------------
# Pallas kernel 1: cosine correlation, max/argmax over t, one-hot gather
# --------------------------------------------------------------------------

def corr_select_kernel(curr_ref, idx_ref, s1_ref, s2_ref, s3_ref,
                       o1_ref, o2_ref, o3_ref, soft_ref):
    # curr_ref : (1, Pb, F)            Pb = feat_num tile, F = feat_len
    # idx_ref / s*_ref : (1, T, Pb, F)
    # o*_ref : (1, Pb, F)   soft_ref : (1, Pb, 1)
    eps2 = 1e-24                                  # (F.normalize eps=1e-12)^2
    curr = curr_ref[0]                            # (P, F) f32
    cn = curr * lax.rsqrt(
        jnp.maximum(jnp.sum(curr * curr, axis=-1, keepdims=True), eps2))

    idx = idx_ref[0]                              # (T, P, F) f32
    raw = jnp.sum(idx * cn[None, :, :], axis=-1)  # (T, P)  un-normalized dot
    inv = lax.rsqrt(
        jnp.maximum(jnp.sum(idx * idx, axis=-1), eps2))
    scores = raw * inv                            # (T, P) cosine similarity

    T, P = scores.shape
    max_tp = jnp.max(scores, axis=0, keepdims=True)            # (1, P)
    t_iota = lax.broadcasted_iota(jnp.int32, (T, P), 0)
    # first index achieving the max (torch.max tie-break)
    arg = jnp.min(jnp.where(scores == max_tp, t_iota, T), axis=0, keepdims=True)
    onehot = (t_iota == arg).astype(curr.dtype)                 # (T, P)

    o1_ref[0] = jnp.sum(onehot[:, :, None] * s1_ref[0], axis=0)
    o2_ref[0] = jnp.sum(onehot[:, :, None] * s2_ref[0], axis=0)
    o3_ref[0] = jnp.sum(onehot[:, :, None] * s3_ref[0], axis=0)
    soft_ref[0] = jnp.sum(onehot * scores, axis=0)[:, None]     # (P, 1)


# --------------------------------------------------------------------------
# Pallas kernel 2: 3x3 fusion conv (transposed, lane-dense) + scale + residual
#   taps formed in-VMEM via pltpu.roll + static boundary mask (no HBM im2col)
# --------------------------------------------------------------------------

def make_fusion_kernel(h, w):
    hw = h * w

    def fusion_kernel(x_ref, w_ref, b_ref, soft_ref, anchor_ref, out_ref):
        # x_ref      : (1, 3c, hw)  bf16   (concat of the 3 selected feature maps)
        # w_ref      : (9, c, 3c)   bf16   (per-tap transposed conv weights)
        # b_ref      : (c, 1)       f32
        # soft_ref   : (1, 1, hw)   f32
        # anchor_ref : (1, c, hw)   f32
        # out_ref    : (1, c, hw)   f32
        x = x_ref[0]                                            # (3c, hw) bf16
        cout = out_ref.shape[1]

        pos = lax.broadcasted_iota(jnp.int32, (1, hw), 1)       # flat pixel index
        row = pos // w
        col = pos - row * w

        acc = jnp.zeros((cout, hw), jnp.float32)
        k = 0
        for di in (-1, 0, 1):
            for dj in (-1, 0, 1):
                if di == 0 and dj == 0:
                    tap = x
                else:
                    shift = (-(di * w + dj)) % hw               # static, >= 0
                    tap = pltpu.roll(x, shift, axis=1)          # tap[p] = x[p+off]
                    valid = ((row + di >= 0) & (row + di < h) &
                             (col + dj >= 0) & (col + dj < w))  # zero padding
                    tap = jnp.where(valid, tap, jnp.zeros_like(tap))
                acc = acc + jnp.dot(w_ref[k], tap,
                                    preferred_element_type=jnp.float32)
                k += 1

        out = (acc + b_ref[...]) * soft_ref[0] + anchor_ref[0]  # f32 epilogue
        out_ref[0] = out.astype(out_ref.dtype)

    return fusion_kernel


# --------------------------------------------------------------------------
# LTAM forward (Pallas)
# --------------------------------------------------------------------------

def ltam_pallas(curr_feat, index_feat_set_s1, anchor_feat,
                sparse_s1, sparse_s2, sparse_s3, location_feat,
                fusion_w, fusion_b, stride=4):
    n, c, h, w = anchor_feat.shape
    t = sparse_s1.shape[1]
    s = stride
    H, W = h // s, w // s
    feat_len = c * s * s
    feat_num = H * W

    # ---- grid_flow normalization + nearest grid_sample (glue) ----
    grid = jnp.transpose(location_feat.reshape(n, t, 2, H, W), (0, 1, 3, 4, 2))
    gx = 2.0 * grid[..., 0] / max(W - 1, 1) - 1.0
    gy = 2.0 * grid[..., 1] / max(H - 1, 1) - 1.0
    grid = jnp.stack([gx, gy], axis=-1).reshape(n * t, H, W, 2)

    def samp(z):
        return grid_sample_nearest_zeros(z.reshape(n * t, feat_len, H, W), grid)

    out1, out2, out3 = samp(sparse_s1), samp(sparse_s2), samp(sparse_s3)
    idx1 = samp(index_feat_set_s1)

    # ---- reshape into kernel-1 layout ----
    curr_unf = jnp.transpose(unfold_s(curr_feat, s), (0, 2, 1))       # (n, P, F)

    def to_tpf(z):
        z = z.reshape(n, t, feat_len, feat_num)
        return jnp.transpose(z, (0, 1, 3, 2))                          # (n, T, P, F)

    idx_tpf = to_tpf(idx1)
    s1_tpf, s2_tpf, s3_tpf = to_tpf(out1), to_tpf(out2), to_tpf(out3)

    # tile feat_num for pipeline depth (multiples of 8 sublanes)
    if feat_num % 128 == 0:
        p_blk = 128
    elif feat_num % 8 == 0:
        p_blk = 8
    else:
        p_blk = feat_num
    n_pb = feat_num // p_blk

    pf_spec = pl.BlockSpec((1, p_blk, feat_len), lambda i, j: (i, j, 0))
    tpf_spec = pl.BlockSpec((1, t, p_blk, feat_len), lambda i, j: (i, 0, j, 0))
    soft_spec = pl.BlockSpec((1, p_blk, 1), lambda i, j: (i, j, 0))

    sel1, sel2, sel3, soft = pl.pallas_call(
        corr_select_kernel,
        out_shape=[jax.ShapeDtypeStruct((n, feat_num, feat_len), jnp.float32)] * 3
                  + [jax.ShapeDtypeStruct((n, feat_num, 1), jnp.float32)],
        grid_spec=pltpu.PrefetchScalarGridSpec(
            num_scalar_prefetch=0,
            grid=(n, n_pb),
            in_specs=[pf_spec, tpf_spec, tpf_spec, tpf_spec, tpf_spec],
            out_specs=[pf_spec, pf_spec, pf_spec, soft_spec]),
        compiler_params=pltpu.CompilerParams(
            dimension_semantics=("parallel", "parallel")),
    )(curr_unf, idx_tpf, s1_tpf, s2_tpf, s3_tpf)

    # ---- fold selected patches back to (n, c, h, w) (glue) ----
    fold1 = fold_s(jnp.transpose(sel1, (0, 2, 1)), s, c, h, w)
    fold2 = fold_s(jnp.transpose(sel2, (0, 2, 1)), s, c, h, w)
    fold3 = fold_s(jnp.transpose(sel3, (0, 2, 1)), s, c, h, w)

    # expand corr_soft (n, feat_num) to full resolution (n, 1, h*w) -- cheap glue
    soft_blk = soft.reshape(n, H, W)
    soft_full = jnp.broadcast_to(
        soft_blk[:, :, None, :, None], (n, H, s, W, s)).reshape(n, 1, h * w)

    # ---- kernel-2 inputs: transposed (channels-on-sublane, pixels-on-lane) ----
    cin = 3 * c
    x_b = jnp.concatenate([fold1, fold2, fold3], axis=1)               # (n, 3c, h, w)
    x_b = x_b.reshape(n, cin, h * w).astype(jnp.bfloat16)              # bf16 activations
    w_t = jnp.transpose(fusion_w, (0, 1, 3, 2)).reshape(9, c, cin)     # (9, Cout, Cin)
    w_t = w_t.astype(jnp.bfloat16)
    b2 = fusion_b.reshape(c, 1).astype(jnp.float32)
    anchor_flat = anchor_feat.reshape(n, c, h * w)                     # no transpose

    # TODO(synk): for large h*w (v7x 64 MiB VMEM), tile the h*w axis with a halo
    #             and set vmem_limit_bytes explicitly; not needed at these sizes.
    fusion_kernel = make_fusion_kernel(h, w)
    out_flat = pl.pallas_call(
        fusion_kernel,
        out_shape=jax.ShapeDtypeStruct((n, c, h * w), jnp.float32),
        grid_spec=pltpu.PrefetchScalarGridSpec(
            num_scalar_prefetch=0,
            grid=(n,),
            in_specs=[
                pl.BlockSpec((1, cin, h * w), lambda i: (i, 0, 0)),
                pl.BlockSpec((9, c, cin), lambda i: (0, 0, 0)),
                pl.BlockSpec((c, 1), lambda i: (0, 0)),
                pl.BlockSpec((1, 1, h * w), lambda i: (i, 0, 0)),
                pl.BlockSpec((1, c, h * w), lambda i: (i, 0, 0)),
            ],
            out_specs=pl.BlockSpec((1, c, h * w), lambda i: (i, 0, 0))),
        compiler_params=pltpu.CompilerParams(
            dimension_semantics=("parallel",)),
    )(x_b, w_t, b2, soft_full, anchor_flat)

    return out_flat.reshape(n, c, h, w)                                # NCHW


# --------------------------------------------------------------------------
# Pure-JAX reference (mirrors the PyTorch forward) for a correctness check
# --------------------------------------------------------------------------

def ltam_reference(curr_feat, index_feat_set_s1, anchor_feat,
                   sparse_s1, sparse_s2, sparse_s3, location_feat,
                   fusion_w, fusion_b, stride=4):
    n, c, h, w = anchor_feat.shape
    t = sparse_s1.shape[1]
    s = stride
    H, W = h // s, w // s
    feat_len = c * s * s
    feat_num = H * W

    grid = jnp.transpose(location_feat.reshape(n, t, 2, H, W), (0, 1, 3, 4, 2))
    gx = 2.0 * grid[..., 0] / max(W - 1, 1) - 1.0
    gy = 2.0 * grid[..., 1] / max(H - 1, 1) - 1.0
    grid = jnp.stack([gx, gy], axis=-1).reshape(n * t, H, W, 2)

    def samp(z):
        return grid_sample_nearest_zeros(z.reshape(n * t, feat_len, H, W), grid)

    out1, out2, out3 = samp(sparse_s1), samp(sparse_s2), samp(sparse_s3)
    idx1 = samp(index_feat_set_s1)

    curr_unf = jnp.transpose(unfold_s(curr_feat, s), (0, 2, 1))        # (n, P, F)
    curr_n = curr_unf / jnp.maximum(
        jnp.sqrt(jnp.sum(curr_unf ** 2, axis=-1, keepdims=True)), 1e-12)

    def to_tpf(z):
        z = z.reshape(n, t, feat_len, feat_num)
        return jnp.transpose(z, (0, 1, 3, 2))

    idx_tpf = to_tpf(idx1)
    s1_tpf, s2_tpf, s3_tpf = to_tpf(out1), to_tpf(out2), to_tpf(out3)

    idx_n = idx_tpf / jnp.maximum(
        jnp.sqrt(jnp.sum(idx_tpf ** 2, axis=-1, keepdims=True)), 1e-12)
    matrix = jnp.einsum('ntpf,npf->npt', idx_n, curr_n,
                        precision=lax.Precision.HIGHEST)               # (n, P, T)
    corr_soft = jnp.max(matrix, axis=2)                                # (n, P)
    corr_index = jnp.argmax(matrix, axis=2)                            # (n, P)

    def gather(z):
        return jnp.take_along_axis(z, corr_index[:, None, :, None], axis=1)[:, 0]

    fold1 = fold_s(jnp.transpose(gather(s1_tpf), (0, 2, 1)), s, c, h, w)
    fold2 = fold_s(jnp.transpose(gather(s2_tpf), (0, 2, 1)), s, c, h, w)
    fold3 = fold_s(jnp.transpose(gather(s3_tpf), (0, 2, 1)), s, c, h, w)
    soft_map = fold_s(jnp.broadcast_to(corr_soft[:, None, :],
                                       (n, feat_len, feat_num)), s, c, h, w)

    cat = jnp.concatenate([fold1, fold2, fold3], axis=1)
    conv = lax.conv_general_dilated(
        cat, fusion_w, window_strides=(1, 1), padding=((1, 1), (1, 1)),
        dimension_numbers=('NCHW', 'HWIO', 'NCHW'),
        precision=lax.Precision.HIGHEST)
    conv = conv + fusion_b[None, :, None, None]
    return conv * soft_map + anchor_feat


# --------------------------------------------------------------------------

if __name__ == "__main__":
    n, c, h, w = 2, 64, 16, 16          # module hardcodes 64 channels (fusion conv)
    t, stride = 3, 4
    H, W = h // stride, w // stride
    feat_len = c * stride * stride

    key = jax.random.PRNGKey(0)
    ks = jax.random.split(key, 10)
    curr_feat = jax.random.normal(ks[0], (n, c, h, w), jnp.float32)
    anchor_feat = jax.random.normal(ks[1], (n, c, h, w), jnp.float32)
    index_s1 = jax.random.normal(ks[2], (n, t, feat_len, H, W), jnp.float32)
    sparse_s1 = jax.random.normal(ks[3], (n, t, feat_len, H, W), jnp.float32)
    sparse_s2 = jax.random.normal(ks[4], (n, t, feat_len, H, W), jnp.float32)
    sparse_s3 = jax.random.normal(ks[5], (n, t, feat_len, H, W), jnp.float32)
    # location map: some coordinates fall out of range -> zeros padding path
    location_feat = jax.random.uniform(ks[6], (n, 2 * t, H, W), jnp.float32,
                                       minval=-1.0, maxval=W + 0.5)
    # deterministic synthetic fusion conv parameters (HWIO)
    fusion_w = 0.05 * jax.random.normal(ks[7], (3, 3, 3 * c, c), jnp.float32)
    fusion_b = 0.01 * jax.random.normal(ks[8], (c,), jnp.float32)

    out = ltam_pallas(curr_feat, index_s1, anchor_feat,
                      sparse_s1, sparse_s2, sparse_s3, location_feat,
                      fusion_w, fusion_b, stride=stride)
    out = jax.block_until_ready(out)

    ref = ltam_reference(curr_feat, index_s1, anchor_feat,
                         sparse_s1, sparse_s2, sparse_s3, location_feat,
                         fusion_w, fusion_b, stride=stride)
    ref = jax.block_until_ready(ref)

    assert out.shape == (n, c, h, w)
    assert jnp.allclose(out, ref, rtol=1e-2, atol=1e-2), (
        float(jnp.max(jnp.abs(out - ref))))
    print("KERNEL_OK")
</pallas_src>

<mosaic_0001>
module attributes {stable_mosaic.version = 11 : i64} {
  func.func @corr_select_kernel(%arg0: i32, %arg1: i32, %arg2: memref<1x8x1024xf32, #tpu.memory_space<vmem>>, %arg3: memref<1x3x8x1024xf32, #tpu.memory_space<vmem>>, %arg4: memref<1x3x8x1024xf32, #tpu.memory_space<vmem>>, %arg5: memref<1x3x8x1024xf32, #tpu.memory_space<vmem>>, %arg6: memref<1x3x8x1024xf32, #tpu.memory_space<vmem>>, %arg7: memref<1x8x1024xf32, #tpu.memory_space<vmem>>, %arg8: memref<1x8x1024xf32, #tpu.memory_space<vmem>>, %arg9: memref<1x8x1024xf32, #tpu.memory_space<vmem>>, %arg10: memref<1x8x1xf32, #tpu.memory_space<vmem>>) attributes {dimension_semantics = [#tpu.dimension_semantics<parallel>, #tpu.dimension_semantics<parallel>], iteration_bounds = array<i64: 2, 2>, scalar_prefetch = 0 : i64, scratch_operands = 0 : i64, tpu.core_type = #tpu.core_type<tc>, window_params = [{transform_indices = @transform_0, window_bounds = array<i64: 1, 8, 1024>}, {transform_indices = @transform_1, window_bounds = array<i64: 1, 3, 8, 1024>}, {transform_indices = @transform_2, window_bounds = array<i64: 1, 3, 8, 1024>}, {transform_indices = @transform_3, window_bounds = array<i64: 1, 3, 8, 1024>}, {transform_indices = @transform_4, window_bounds = array<i64: 1, 3, 8, 1024>}, {transform_indices = @transform_5, window_bounds = array<i64: 1, 8, 1024>}, {transform_indices = @transform_6, window_bounds = array<i64: 1, 8, 1024>}, {transform_indices = @transform_7, window_bounds = array<i64: 1, 8, 1024>}, {transform_indices = @transform_8, window_bounds = array<i64: 1, 8, 1>}]} {
    %c0 = arith.constant 0 : index
    %c0_0 = arith.constant 0 : index
    %c0_1 = arith.constant 0 : index
    %0 = vector.load %arg2[%c0, %c0_0, %c0_1] : memref<1x8x1024xf32, #tpu.memory_space<vmem>>, vector<1x8x1024xf32>
    %1 = vector.shape_cast %0 : vector<1x8x1024xf32> to vector<8x1024xf32>
    %2 = arith.mulf %1, %1 : vector<8x1024xf32>
    %cst = arith.constant dense<0.000000e+00> : vector<8xf32>
    %3 = vector.multi_reduction <add>, %2, %cst [1] : vector<8x1024xf32> to vector<8xf32>
    %4 = vector.shape_cast %3 : vector<8xf32> to vector<8x1xf32>
    %cst_2 = arith.constant 1.000000e-24 : f32
    %5 = vector.broadcast %cst_2 : f32 to vector<8x1xf32>
    %6 = arith.maximumf %4, %5 : vector<8x1xf32>
    %7 = math.rsqrt %6 : vector<8x1xf32>
    %8 = vector.broadcast %7 : vector<8x1xf32> to vector<8x1024xf32>
    %9 = arith.mulf %1, %8 : vector<8x1024xf32>
    %c0_3 = arith.constant 0 : index
    %c0_4 = arith.constant 0 : index
    %c0_5 = arith.constant 0 : index
    %c0_6 = arith.constant 0 : index
    %10 = vector.load %arg3[%c0_3, %c0_4, %c0_5, %c0_6] : memref<1x3x8x1024xf32, #tpu.memory_space<vmem>>, vector<1x3x8x1024xf32>
    %11 = vector.shape_cast %10 : vector<1x3x8x1024xf32> to vector<3x8x1024xf32>
    %12 = vector.shape_cast %9 : vector<8x1024xf32> to vector<1x8x1024xf32>
    %13 = vector.broadcast %12 : vector<1x8x1024xf32> to vector<3x8x1024xf32>
    %14 = arith.mulf %11, %13 : vector<3x8x1024xf32>
    %cst_7 = arith.constant dense<0.000000e+00> : vector<3x8xf32>
    %15 = vector.multi_reduction <add>, %14, %cst_7 [2] : vector<3x8x1024xf32> to vector<3x8xf32>
    %16 = arith.mulf %11, %11 : vector<3x8x1024xf32>
    %cst_8 = arith.constant dense<0.000000e+00> : vector<3x8xf32>
    %17 = vector.multi_reduction <add>, %16, %cst_8 [2] : vector<3x8x1024xf32> to vector<3x8xf32>
    %cst_9 = arith.constant 1.000000e-24 : f32
    %18 = vector.broadcast %cst_9 : f32 to vector<3x8xf32>
    %19 = arith.maximumf %17, %18 : vector<3x8xf32>
    %20 = math.rsqrt %19 : vector<3x8xf32>
    %21 = arith.mulf %15, %20 : vector<3x8xf32>
    %cst_10 = arith.constant dense<0xFF800000> : vector<8xf32>
    %22 = vector.multi_reduction <maximumf>, %21, %cst_10 [0] : vector<3x8xf32> to vector<8xf32>
    %23 = vector.shape_cast %22 : vector<8xf32> to vector<1x8xf32>
    %24 = tpu.iota {dimensions = array<i32: 0>} : vector<3x8xi32>
    %25 = vector.broadcast %23 : vector<1x8xf32> to vector<3x8xf32>
    %26 = arith.cmpf oeq, %21, %25 : vector<3x8xf32>
    %c3_i32 = arith.constant 3 : i32
    %27 = vector.broadcast %c3_i32 : i32 to vector<3x8xi32>
    %28 = arith.select %26, %24, %27 : vector<3x8xi1>, vector<3x8xi32>
    %cst_11 = arith.constant dense<2147483647> : vector<8xi32>
    %29 = vector.multi_reduction <minsi>, %28, %cst_11 [0] : vector<3x8xi32> to vector<8xi32>
    %30 = vector.shape_cast %29 : vector<8xi32> to vector<1x8xi32>
    %31 = vector.broadcast %30 : vector<1x8xi32> to vector<3x8xi32>
    %32 = arith.cmpi eq, %24, %31 : vector<3x8xi32>
    %33 = arith.extui %32 : vector<3x8xi1> to vector<3x8xi32>
    %34 = arith.sitofp %33 : vector<3x8xi32> to vector<3x8xf32>
    %35 = vector.shape_cast %34 : vector<3x8xf32> to vector<3x8x1xf32>
    %c0_12 = arith.constant 0 : index
    %c0_13 = arith.constant 0 : index
    %c0_14 = arith.constant 0 : index
    %c0_15 = arith.constant 0 : index
    %36 = vector.load %arg4[%c0_12, %c0_13, %c0_14, %c0_15] : memref<1x3x8x1024xf32, #tpu.memory_space<vmem>>, vector<1x3x8x1024xf32>
    %37 = vector.shape_cast %36 : vector<1x3x8x1024xf32> to vector<3x8x1024xf32>
    %38 = vector.broadcast %35 : vector<3x8x1xf32> to vector<3x8x1024xf32>
    %39 = arith.mulf %38, %37 : vector<3x8x1024xf32>
    %cst_16 = arith.constant dense<0.000000e+00> : vector<8x1024xf32>
    %40 = vector.multi_reduction <add>, %39, %cst_16 [0] : vector<3x8x1024xf32> to vector<8x1024xf32>
    %c0_17 = arith.constant 0 : index
    %c0_18 = arith.constant 0 : index
    %c0_19 = arith.constant 0 : index
    %41 = vector.load %arg7[%c0_17, %c0_18, %c0_19] : memref<1x8x1024xf32, #tpu.memory_space<vmem>>, vector<1x8x1024xf32>
    %42 = vector.shape_cast %41 : vector<1x8x1024xf32> to vector<8x1024xf32>
    %43 = vector.shape_cast %40 : vector<8x1024xf32> to vector<1x8x1024xf32>
    tpu.vector_store %arg7[%c0_17, %c0_18, %c0_19], %43 {strides = array<i32>} : memref<1x8x1024xf32, #tpu.memory_space<vmem>>, vector<1x8x1024xf32>,
    %44 = vector.shape_cast %34 : vector<3x8xf32> to vector<3x8x1xf32>
    %c0_20 = arith.constant 0 : index
    %c0_21 = arith.constant 0 : index
    %c0_22 = arith.constant 0 : index
    %c0_23 = arith.constant 0 : index
    %45 = vector.load %arg5[%c0_20, %c0_21, %c0_22, %c0_23] : memref<1x3x8x1024xf32, #tpu.memory_space<vmem>>, vector<1x3x8x1024xf32>
    %46 = vector.shape_cast %45 : vector<1x3x8x1024xf32> to vector<3x8x1024xf32>
    %47 = vector.broadcast %44 : vector<3x8x1xf32> to vector<3x8x1024xf32>
    %48 = arith.mulf %47, %46 : vector<3x8x1024xf32>
    %cst_24 = arith.constant dense<0.000000e+00> : vector<8x1024xf32>
    %49 = vector.multi_reduction <add>, %48, %cst_24 [0] : vector<3x8x1024xf32> to vector<8x1024xf32>
    %c0_25 = arith.constant 0 : index
    %c0_26 = arith.constant 0 : index
    %c0_27 = arith.constant 0 : index
    %50 = vector.load %arg8[%c0_25, %c0_26, %c0_27] : memref<1x8x1024xf32, #tpu.memory_space<vmem>>, vector<1x8x1024xf32>
    %51 = vector.shape_cast %50 : vector<1x8x1024xf32> to vector<8x1024xf32>
    %52 = vector.shape_cast %49 : vector<8x1024xf32> to vector<1x8x1024xf32>
    tpu.vector_store %arg8[%c0_25, %c0_26, %c0_27], %52 {strides = array<i32>} : memref<1x8x1024xf32, #tpu.memory_space<vmem>>, vector<1x8x1024xf32>,
    %53 = vector.shape_cast %34 : vector<3x8xf32> to vector<3x8x1xf32>
    %c0_28 = arith.constant 0 : index
    %c0_29 = arith.constant 0 : index
    %c0_30 = arith.constant 0 : index
    %c0_31 = arith.constant 0 : index
    %54 = vector.load %arg6[%c0_28, %c0_29, %c0_30, %c0_31] : memref<1x3x8x1024xf32, #tpu.memory_space<vmem>>, vector<1x3x8x1024xf32>
    %55 = vector.shape_cast %54 : vector<1x3x8x1024xf32> to vector<3x8x1024xf32>
    %56 = vector.broadcast %53 : vector<3x8x1xf32> to vector<3x8x1024xf32>
    %57 = arith.mulf %56, %55 : vector<3x8x1024xf32>
    %cst_32 = arith.constant dense<0.000000e+00> : vector<8x1024xf32>
    %58 = vector.multi_reduction <add>, %57, %cst_32 [0] : vector<3x8x1024xf32> to vector<8x1024xf32>
    %c0_33 = arith.constant 0 : index
    %c0_34 = arith.constant 0 : index
    %c0_35 = arith.constant 0 : index
    %59 = vector.load %arg9[%c0_33, %c0_34, %c0_35] : memref<1x8x1024xf32, #tpu.memory_space<vmem>>, vector<1x8x1024xf32>
    %60 = vector.shape_cast %59 : vector<1x8x1024xf32> to vector<8x1024xf32>
    %61 = vector.shape_cast %58 : vector<8x1024xf32> to vector<1x8x1024xf32>
    tpu.vector_store %arg9[%c0_33, %c0_34, %c0_35], %61 {strides = array<i32>} : memref<1x8x1024xf32, #tpu.memory_space<vmem>>, vector<1x8x1024xf32>,
    %62 = arith.mulf %34, %21 : vector<3x8xf32>
    %cst_36 = arith.constant dense<0.000000e+00> : vector<8xf32>
    %63 = vector.multi_reduction <add>, %62, %cst_36 [0] : vector<3x8xf32> to vector<8xf32>
    %64 = vector.shape_cast %63 : vector<8xf32> to vector<8x1xf32>
    %c0_37 = arith.constant 0 : index
    %c0_38 = arith.constant 0 : index
    %c0_39 = arith.constant 0 : index
    %65 = vector.load %arg10[%c0_37, %c0_38, %c0_39] : memref<1x8x1xf32, #tpu.memory_space<vmem>>, vector<1x8x1xf32>
    %66 = vector.shape_cast %65 : vector<1x8x1xf32> to vector<8x1xf32>
    %67 = vector.shape_cast %64 : vector<8x1xf32> to vector<1x8x1xf32>
    tpu.vector_store %arg10[%c0_37, %c0_38, %c0_39], %67 {strides = array<i32>} : memref<1x8x1xf32, #tpu.memory_space<vmem>>, vector<1x8x1xf32>,
    return
  }
  func.func @transform_0(%arg0: i32, %arg1: i32) -> (i32, i32, i32) {
    %c0_i32 = arith.constant 0 : i32
    %c0_i32_0 = arith.constant 0 : i32
    return %arg0, %arg1, %c0_i32 : i32, i32, i32
  }
  func.func @transform_1(%arg0: i32, %arg1: i32) -> (i32, i32, i32, i32) {
    %c0_i32 = arith.constant 0 : i32
    %c0_i32_0 = arith.constant 0 : i32
    %c0_i32_1 = arith.constant 0 : i32
    return %arg0, %c0_i32, %arg1, %c0_i32_0 : i32, i32, i32, i32
  }
  func.func @transform_2(%arg0: i32, %arg1: i32) -> (i32, i32, i32, i32) {
    %c0_i32 = arith.constant 0 : i32
    %c0_i32_0 = arith.constant 0 : i32
    %c0_i32_1 = arith.constant 0 : i32
    return %arg0, %c0_i32, %arg1, %c0_i32_0 : i32, i32, i32, i32
  }
  func.func @transform_3(%arg0: i32, %arg1: i32) -> (i32, i32, i32, i32) {
    %c0_i32 = arith.constant 0 : i32
    %c0_i32_0 = arith.constant 0 : i32
    %c0_i32_1 = arith.constant 0 : i32
    return %arg0, %c0_i32, %arg1, %c0_i32_0 : i32, i32, i32, i32
  }
  func.func @transform_4(%arg0: i32, %arg1: i32) -> (i32, i32, i32, i32) {
    %c0_i32 = arith.constant 0 : i32
    %c0_i32_0 = arith.constant 0 : i32
    %c0_i32_1 = arith.constant 0 : i32
    return %arg0, %c0_i32, %arg1, %c0_i32_0 : i32, i32, i32, i32
  }
  func.func @transform_5(%arg0: i32, %arg1: i32) -> (i32, i32, i32) {
    %c0_i32 = arith.constant 0 : i32
    %c0_i32_0 = arith.constant 0 : i32
    return %arg0, %arg1, %c0_i32 : i32, i32, i32
  }
  func.func @transform_6(%arg0: i32, %arg1: i32) -> (i32, i32, i32) {
    %c0_i32 = arith.constant 0 : i32
    %c0_i32_0 = arith.constant 0 : i32
    return %arg0, %arg1, %c0_i32 : i32, i32, i32
  }
  func.func @transform_7(%arg0: i32, %arg1: i32) -> (i32, i32, i32) {
    %c0_i32 = arith.constant 0 : i32
    %c0_i32_0 = arith.constant 0 : i32
    return %arg0, %arg1, %c0_i32 : i32, i32, i32
  }
  func.func @transform_8(%arg0: i32, %arg1: i32) -> (i32, i32, i32) {
    %c0_i32 = arith.constant 0 : i32
    %c0_i32_0 = arith.constant 0 : i32
    return %arg0, %arg1, %c0_i32 : i32, i32, i32
  }
}

</mosaic_0001>

<bundles_post_ra>
// kernel: tpu_custom_call.1
= control target key start
LH: loop header
LB: loop body
LE: loop exit
PB: predicated region body
PF: predicated region fallthrough
CT: control target
= control target key end

     0   :  { %s2709_s0 = inlined_call_operand.hbm [shape: f32[2,16,1024], index: 0, kind: input, shape index: {}]   ;;  %s2710_s1 = inlined_call_operand.hbm [shape: f32[2,3,16,1024], index: 1, kind: input, shape index: {}]   ;;  %s2711_s2 = inlined_call_operand.hbm [shape: f32[2,3,16,1024], index: 2, kind: input, shape index: {}]   ;;  %s2712_s3 = inlined_call_operand.hbm [shape: f32[2,3,16,1024], index: 3, kind: input, shape index: {}]   ;;  %s2713_s4 = inlined_call_operand.hbm [shape: f32[2,3,16,1024], index: 4, kind: input, shape index: {}]   ;;  %s2714_s5 = inlined_call_operand.hbm [shape: f32[2,16,1024], index: 5, kind: output, shape index: {0}]   ;;  %s2715_s6 = inlined_call_operand.hbm [shape: f32[2,16,1024], index: 6, kind: output, shape index: {1}]   ;;  %s2716_s7 = inlined_call_operand.hbm [shape: f32[2,16,1024], index: 7, kind: output, shape index: {2}]   ;;  %s2717_s8 = inlined_call_operand.vmem [shape: f32[2,16,1], index: 8, kind: output, shape index: {3}]  }
   0x1   :  { %2741 = sst [smem:[#allocation33_spill]] %s2710_s1 }
   0x2   :  { %2742 = sst [smem:[#allocation34_spill]] %s2712_s3 }
   0x3   :  { %2743 = sst [smem:[#allocation35_spill]] %s2714_s5 }
   0x4   :  { %2744 = sst [smem:[#allocation36_spill]] %s2715_s6 }
   0x5   :  { %2745 = sst [smem:[#allocation37_spill]] %s2716_s7 }
   0x6   :  { %2746 = sst [smem:[#allocation38_spill]] %s2717_s8 }
   0x7   :  { %14 = vsyncpa [#allocation3], 0 }
   0x8   :  { %16 = vsyncpa [#allocation3 + $0x1], 0 }
   0x9   :  { %17 = vsyncpa [#allocation6], 0 }
   0xa   :  { %19 = vsyncpa [#allocation6 + $0x1], 0 }
   0xb   :  { %20 = vsyncpa [#allocation9], 0 }
   0xc   :  { %22 = vsyncpa [#allocation9 + $0x1], 0 }
   0xd   :  { %23 = vsyncpa [#allocation4], 0 }
   0xe   :  { %25 = vsyncpa [#allocation4 + $0x1], 0 }
   0xf   :  { %26 = vsyncpa [#allocation13], 0 }
  0x10   :  { %28 = vsyncpa [#allocation13 + $0x1], 0  ;;  %s1923_s27 = smov 0   ;;  %s1925_s28 = smov 0  }
  0x11   :  { %s1927_s29 = smov 0   ;;  %s1929_s30 = smov 0  }
  0x12   :  { %s1931_s9 = smov 0   ;;  %s1933_s10 = smov 0  }
  0x13   :  { %s1935_s11 = smov 0   ;;  %s1937_s12 = smov 0  }
  0x14 LB: > { %2747 = sst [smem:[#allocation20_spill]] %s1835_s27  ;;  %s1964_s13 = sadd.s32 4294967295, %s1863_s12   ;;  %s1863_s12 = sphi %s1937_s12, %s34_s12   ;;  %s1859_s11 = sphi %s1935_s11, %s2795_s11   ;;  %s1855_s10 = sphi %s1933_s10, %s2794_s10   ;;  %s1851_s9 = sphi %s1931_s9, %s2793_s9   ;;  %s1847_s30 = sphi %s1929_s30, %s2792_s30   ;;  %s1843_s29 = sphi %s1927_s29, %s2789_s29   ;;  %s1839_s28 = sphi %s1925_s28, %s2788_s28   ;;  %s1835_s27 = sphi %s1923_s27, %s2787_s27  }
  0x15   : > { %2748 = sst [smem:[#allocation21_spill]] %s1839_s28  ;;  %s2720_s14 = sadd.s32 4294967294, %s1863_s12  }
  0x16   : > { %2749 = sst [smem:[#allocation22_spill]] %s1843_s29  ;;  %s43_s15 = sadd.s32 1, %s1855_s10 }
  0x17   : > { %2750 = sst [smem:[#allocation23_spill]] %s1847_s30  ;;  %s46_s16 = sadd.s32 1, %s1859_s11 }
  0x18   : > { %2751 = sst [smem:[#allocation24_spill]] %s1851_s9  ;;  %p44_p0 = scmp.ge.s32.totalorder %s43_s15, 2 }
  0x19   : > { %2752 = sst [smem:[#allocation25_spill]] %s1863_s12  ;;  %s55_s17 = sadd.s32 1, %s1843_s29 }
  0x1a   : > { %2753 = sst [smem:[#allocation26_spill]] %s1964_s13  ;;  %p62_p1 = scmp.ne.s32.totalorder %s1843_s29, %s1839_s28 }
  0x1b   : > { %p63_p2 = scmp.eq.s32.totalorder %s1863_s12, 0  ;;  %s2797_s15 = smov (%p44_p0, %s43_s15), 0 }
  0x1c   : > { %2754 = sst [smem:[#allocation27_spill]] %s2797_s15  ;;  %s2799_s16 = smov (!%p44_p0, %s46_s16), %s1859_s11 }
  0x1d   : > { %s51_s18 = ssub.s32 %s1855_s10, %s2797_s15  ;;  %p1978_p3 = por %p63_p2, %p62_p1 }
  0x1e   : > { %p48_p4 = scmp.ge.s32.totalorder %s2799_s16, 2  ;;  %p68_p5 = scmp.ne.s32.totalorder %s1839_s28, %s1835_s27 }
  0x1f   : > { %p69_p6 = scmp.eq.s32.totalorder %s1964_s13, 0  ;;  %p206_p7 = scmp.eq.s32.totalorder %s1964_s13, 3 }
  0x20   : > { %s2801_s16 = smov (%p48_p4, %s2799_s16), 0  ;;  %p212_p10 = scmp.eq.s32.totalorder %s2720_s14, 3 }
  0x21   : > { %2756 = sst [smem:[#allocation28_spill]] %s2801_s16  ;;  %p1988_p8 = por %p69_p6, %p68_p5 }
  0x22   : > { %p1992_p9 = por %p206_p7, %p62_p1  ;;  %s50_s22 = ssub.s32 %s1859_s11, %s2801_s16 }
  0x23   : > { %s2757_s20 = scalar_select %p1988_p8, 1, 0 }
  0x24   : > { %s2759_s21 = scalar_select %p1992_p9, 1, 0 }
  0x25   : > { %2758 = sst [smem:[#allocation29_spill]] %s2757_s20  ;;  %s52_s23 = sor.u32 %s51_s18, %s50_s22 }
  0x26   : > { %2760 = sst [smem:[#allocation30_spill]] %s2759_s21  ;;  %p53_p11 = scmp.eq.s32.totalorder %s52_s23, 0 }
  0x27   : > { %p2000_p12 = por %p212_p10, %p68_p5  ;;  %p1482_p13 = scmp.lt.s32.totalorder %s1863_s12, 4 }
  0x28   : > { %s2006_s25 = sand.u32 1, %s1843_s29   ;;  %s2726_s15 = sshll.u32 %s1855_s10, 3 }
  0x29   : > { %s2761_s24 = scalar_select %p2000_p12, 1, 0 }
  0x2a   : > { %s2009_s26 = scalar_select %p53_p11, %s1843_s29, %s55_s17  }
  0x2b   : > { %2762 = sst [smem:[#allocation31_spill]] %s2761_s24  ;;  %p2014_p0 = pnand %p1482_p13, %p1978_p3 }
  0x2c   : > { %2763 = sst [smem:[#allocation32_spill]] %s2009_s26  ;;  %s2727_s18 = sand.u32 1, %s1863_s12  }
  0x2d   : > { %s2020_s22 = smul.u32 192, %s2006_s25  ;;  %s2765_s1 = sld [smem:[#allocation33_spill]] }
  0x2e   : > { %s1432_s23 = smul.u32 48, %s1859_s11  ;;  %s2034_s29 = scalar_lea.sflag [#allocation6], %s2727_s18 }
  0x2f   : > { %s341_s14 = scalar_lea.vmem [#allocation5], %s2020_s22  ;;  %p2038_p1 = pneg %p2014_p0 }
  0x30   : > { %s350_s16 = sshll.u32 %s341_s14, 4  ;;  %s347_s24 = sadd.s32 %s1432_s23, %s2726_s15  ;;  %s351_s16 = int_to_ptr.vmem [resolvable:$true] %s350_s16 }
  0x31   : > { %s2026_s7 = sshll.u32 %s347_s24, 7  ;;  %s1576_s14 = scalar_lea.vmem %s351_s16, 3072 }
  0x32   : > { %p1577_p2 = scmp.ne.s32.totalorder %s351_s16, %s1576_s14  ;;  %s1865_s24 = smov [#allocation5]  }
  0x33   : > { %s349_s26 = scalar_lea.hbm %s2765_s1, %s2026_s7  ;;  %s1581_s23 = sshll.u32 %s1865_s24, 4  ;;  %s1582_s23 = int_to_ptr.vmem [resolvable:$false] %s1581_s23 }
  0x34   : > { %p1579_p3 = pnand %p1577_p2, %p2038_p1  ;;  %s1583_s15 = scalar_lea.vmem %s1582_s23, 6144 }
  0x35   : > { %p1584_p5 = scmp.lt.s32.totalorder %s351_s16, %s1582_s23  ;;  %p1585_p6 = scmp.lt.s32.totalorder %s1583_s15, %s1576_s14 }
  0x36   : > { %p1580_p4 = pneg %p1579_p3 }
  0x37   : > { %p1586_p7 = por %p1585_p6, %p1584_p5 }
  0x39   : > { %p1587_p10 = pnand %p1586_p7, %p1580_p4 }
  0x3b   : > { %1590 = shalt.err (!%p1587_p10)
}
  0x3c   : > { %s2732_s17 = smov 2048   ;;  %s1867_s19 = smov 1024  }
  0x3d   : > { %s1868_s18 = smov 64   ;;  %p1409_p11 = scmp.ge.s32.totalorder %s1863_s12, 1 }
  0x3e   : > { %1462 = dma.hbm_to_vmem [thread:$0]  (!%p2014_p0), %s349_s26, 3072, %s351_s16, %s2034_s29, %s2732_s17, %s1867_s19, %s1868_s18  }
  0x3f   : > { %p427_p13 = scmp.lt.s32.totalorder %s1863_s12, 5  ;;  %s2768_s3 = sld [smem:[#allocation34_spill]] }
  0x40   : > { %s387_s1 = scalar_lea.vmem [#allocation8], %s2020_s22  ;;  %s2769_s8 = sand.u32 1, %s1863_s12  }
  0x41   : > { %p2052_p2 = pnand %p1409_p11, %p427_p13  ;;  %s396_s21 = sshll.u32 %s387_s1, 4  ;;  %s397_s21 = int_to_ptr.vmem [resolvable:$true] %s396_s21 }
  0x42   : > { %s2063_s6 = scalar_lea.sflag [#allocation9], %s2769_s8  ;;  %s1604_s30 = scalar_lea.vmem %s397_s21, 3072 }
  0x43   : > { %p1605_p3 = scmp.ne.s32.totalorder %s397_s21, %s1604_s30  ;;  %s1869_s16 = smov [#allocation8]  }
  0x44   : > { %s1609_s26 = sshll.u32 %s1869_s16, 4  ;;  %s1610_s26 = int_to_ptr.vmem [resolvable:$false] %s1609_s26 }
  0x45   : > { %s395_s23 = scalar_lea.hbm %s2768_s3, %s2026_s7  ;;  %p1607_p4 = pnand %p1605_p3, %p2038_p1 }
  0x46   : > { %s1611_s17 = scalar_lea.vmem %s1610_s26, 6144  ;;  %p1612_p6 = scmp.lt.s32.totalorder %s397_s21, %s1610_s26 }
  0x47   : > { %p1608_p5 = pneg %p1607_p4  ;;  %p1613_p7 = scmp.lt.s32.totalorder %s1611_s17, %s1604_s30 }
  0x49   : > { %p1614_p10 = por %p1613_p7, %p1612_p6 }
  0x4b   : > { %p1615_p11 = pnand %p1614_p10, %p1608_p5 }
  0x4d   : > { %1618 = shalt.err (!%p1615_p11)
}
  0x4e   : > { %s2770_s1 = smov 2048   ;;  %s1397_s8 = sshll.u32 %s2006_s25, 6 }
  0x4f   : > { %1468 = dma.hbm_to_vmem [thread:$0]  (!%p2014_p0), %s395_s23, 3072, %s397_s21, %s2063_s6, %s2770_s1, %s1867_s19, %s1868_s18  }
  0x50   : > { %s1399_s14 = sshll.u32 %s1859_s11, 4  ;;  %s2771_s24 = sshll.u32 %s1855_s10, 3 }
  0x51   : > { %s326_s16 = sadd.s32 %s1399_s14, %s2771_s24  ;;  %s320_s30 = scalar_lea.vmem [#allocation2], %s1397_s8 }
  0x52   : > { %s330_s17 = sshll.u32 %s320_s30, 4  ;;  %s1400_s26 = sshll.u32 %s326_s16, 7  ;;  %s331_s17 = int_to_ptr.vmem [resolvable:$true] %s330_s17 }
  0x53   : > { %s328_s9 = scalar_lea.hbm %s2709_s0, %s1400_s26  ;;  %s317_s13 = scalar_lea.sflag [#allocation3], %s2006_s25 }
  0x54   : > { %s1632_s20 = scalar_lea.vmem %s331_s17, 1024  ;;  %s1870_s28 = smov [#allocation2]  }
  0x55   : > { %p1633_p13 = scmp.ne.s32.totalorder %s331_s17, %s1632_s20  ;;  %s1637_s21 = sshll.u32 %s1870_s28, 4  ;;  %s1638_s21 = int_to_ptr.vmem [resolvable:$false] %s1637_s21 }
  0x56   : > { %s1639_s23 = scalar_lea.vmem %s1638_s21, 2048  ;;  %p1640_p5 = scmp.lt.s32.totalorder %s331_s17, %s1638_s21 }
  0x57   : > { %p1635_p3 = pnand %p1633_p13, %p2038_p1  ;;  %p1641_p6 = scmp.lt.s32.totalorder %s1639_s23, %s1632_s20 }
  0x59   : > { %p1636_p4 = pneg %p1635_p3  ;;  %p1642_p7 = por %p1641_p6, %p1640_p5 }
  0x5b   : > { %p1643_p10 = pnand %p1642_p7, %p1636_p4 }
  0x5d   : > { %1646 = shalt.err (!%p1643_p10)
}
  0x5e   : > { %1459 = dma.hbm_to_vmem [thread:$0]  (!%p2014_p0), %s328_s9, 1024, %s331_s17, %s317_s13  }
  0x5f   : > { %s372_s25 = scalar_lea.hbm %s2711_s2, %s2026_s7  ;;  %s364_s8 = scalar_lea.vmem [#allocation7], %s2020_s22 }
  0x60   : > { %s373_s14 = sshll.u32 %s364_s8, 4  ;;  %s1871_s20 = smov [#allocation7]   ;;  %s374_s14 = int_to_ptr.vmem [resolvable:$true] %s373_s14 }
  0x61   : > { %s1660_s28 = scalar_lea.vmem %s374_s14, 3072  ;;  %s1665_s24 = sshll.u32 %s1871_s20, 4  ;;  %s1666_s24 = int_to_ptr.vmem [resolvable:$false] %s1665_s24 }
  0x62   : > { %p1661_p11 = scmp.ne.s32.totalorder %s374_s14, %s1660_s28  ;;  %s1667_s16 = scalar_lea.vmem %s1666_s24, 6144 }
  0x63   : > { %p1668_p4 = scmp.lt.s32.totalorder %s374_s14, %s1666_s24  ;;  %p1669_p5 = scmp.lt.s32.totalorder %s1667_s16, %s1660_s28 }
  0x64   : > { %p1663_p13 = pnand %p1661_p11, %p2038_p1 }
  0x65   : > { %p1670_p6 = por %p1669_p5, %p1668_p4 }
  0x66   : > { %p1664_p3 = pneg %p1663_p13 }
  0x68   : > { %p1671_p7 = pnand %p1670_p6, %p1664_p3 }
  0x6a   : > { %1674 = shalt.err (!%p1671_p7)
}
  0x6b   : > { %1465 = dma.hbm_to_vmem [thread:$0]  (!%p2014_p0), %s372_s25, 3072, %s374_s14, %s2034_s29, %s2770_s1, %s1867_s19, %s1868_s18  }
  0x6c   : > { %s418_s30 = scalar_lea.hbm %s2713_s4, %s2026_s7  ;;  %s410_s17 = scalar_lea.vmem [#allocation10], %s2020_s22 }
  0x6d   : > { %s419_s26 = sshll.u32 %s410_s17, 4  ;;  %s1872_s23 = smov [#allocation10]   ;;  %s420_s26 = int_to_ptr.vmem [resolvable:$true] %s419_s26 }
  0x6e   : > { %s1688_s21 = scalar_lea.vmem %s420_s26, 3072  ;;  %s1693_s3 = sshll.u32 %s1872_s23, 4  ;;  %s1694_s3 = int_to_ptr.vmem [resolvable:$false] %s1693_s3 }
  0x6f   : > { %p1689_p10 = scmp.ne.s32.totalorder %s420_s26, %s1688_s21  ;;  %s1695_s12 = scalar_lea.vmem %s1694_s3, 6144 }
  0x70   : > { %p1696_p3 = scmp.lt.s32.totalorder %s420_s26, %s1694_s3  ;;  %p1697_p4 = scmp.lt.s32.totalorder %s1695_s12, %s1688_s21 }
  0x71   : > { %p1691_p11 = pnand %p1689_p10, %p2038_p1 }
  0x72   : > { %p1698_p5 = por %p1697_p4, %p1696_p3 }
  0x73   : > { %p1692_p13 = pneg %p1691_p11 }
  0x75   : > { %p1699_p6 = pnand %p1698_p5, %p1692_p13 }
  0x77   : > { %1702 = shalt.err (!%p1699_p6)
}
  0x78   : > { %1471 = dma.hbm_to_vmem [thread:$0]  (!%p2014_p0), %s418_s30, 3072, %s420_s26, %s2063_s6, %s2770_s1, %s1867_s19, %s1868_s18  }
  0x79   : > { %431 = sbr.rel (%p2052_p2) target bundleno = 809 (0x329), region = 40  ;;  %s2772_s5 = sld [smem:[#allocation21_spill]] (!%p2052_p2) }
  0x7f   : > { %s2114_s29 = sand.u32 1, %s2772_s5  }
  0x80   : > { %s2117_s22 = sshll.u32 %s2114_s29, 6  ;;  %s434_s25 = scalar_lea.sflag [#allocation3], %s2114_s29 }
  0x81   : > { %s437_s8 = scalar_lea.vmem [#allocation2], %s2117_s22 }
  0x82   : > { %1814 = dma.done.wait (%p1988_p8), %s434_s25, 1024  }
  0x83   : > { %1816 = vsyncadd (%p1988_p8), %s434_s25, 4294966272  ;;  %s2774_s6 = sld [smem:[#allocation26_spill]]  ;;  %s2129_s18 = smul.u32 192, %s2114_s29 }
  0x85   : > { %s2133_s15 = scalar_lea.vmem [#allocation5], %s2129_s18 }
  0x89   : > { %s2126_s27 = sand.u32 1, %s2774_s6  }
  0x8a   : > { %s443_s19 = scalar_lea.sflag [#allocation6], %s2126_s27 }
  0x8b   : > { %1818 = dma.done.wait (%p1988_p8), %s443_s19, 6144  }
  0x8c   : > { %1820 = vsyncadd (%p1988_p8), %s443_s19, 4294961152  ;;  %s2140_s1 = scalar_lea.vmem [#allocation7], %s2129_s18  ;;  %s461_s14 = scalar_lea.sflag [#allocation9], %s2126_s27 }
  0x8d   : > { %s2144_s28 = scalar_lea.vmem [#allocation8], %s2129_s18 }
  0x8e   : > { %1822 = dma.done.wait (%p1988_p8), %s461_s14, 6144  }
  0x8f   : > { %1824 = vsyncadd (%p1988_p8), %s461_s14, 4294961152  ;;  %v2150_v0 = vld [vmem:[%s437_s8] sm:$0xff]  ;;  %v2152_v1 = vld [vmem:[%s437_s8 + $0x8] sm:$0xff]  ;;  %vm761_vm0 = vcmask 1041409   ;;  %vm762_vm1 = vcmask 1042434   ;;  %vm744_vm2 = vcmask 7168  }
  0x90   : > { %v2154_v2 = vld [vmem:[%s437_s8 + $0x10] sm:$0xff]  ;;  %v2156_v3 = vld [vmem:[%s437_s8 + $0x18] sm:$0xff]  ;;  %v560_v4 = vmul.f32 %v2150_v0, %v2150_v0  ;;  %v561_v5 = vmul.f32 %v2152_v1, %v2152_v1  ;;  %v2164_v7 = vld [vmem:[%s437_s8 + $0x20] sm:$0xff]  ;;  %vm1023_vm9 = vcmask 59392   ;;  %s2775_s20 = sld [smem:[#allocation24_spill]]  ;;  %s2413_s3 = scalar_lea.vmem [#allocation12], %s2117_s22 }
  0x91   : > { %v562_v6 = vmul.f32 %v2154_v2, %v2154_v2  ;;  %v563_v8 = vmul.f32 %v2156_v3, %v2156_v3  ;;  %v2168_v10 = vld [vmem:[%s437_s8 + $0x28] sm:$0xff]  ;;  %v564_v11 = vmul.f32 %v2164_v7, %v2164_v7  ;;  %v2172_v13 = vld [vmem:[%s437_s8 + $0x30] sm:$0xff]  ;;  %v2176_v16 = vld [vmem:[%s437_s8 + $0x38] sm:$0xff]  ;;  %s2776_s24 = sld [smem:[#allocation23_spill]]  ;;  %s1086_s12 = sshll.u32 %s2413_s3, 4  ;;  %s2440_s12 = int_to_ptr.vmem [resolvable:$true] %s1086_s12 }
  0x92   : > { %v568_v9 = vadd.f32 %v561_v5, %v560_v4  ;;  %v565_v14 = vmul.f32 %v2168_v10, %v2168_v10  ;;  %v566_v17 = vmul.f32 %v2172_v13, %v2172_v13  ;;  %v567_v19 = vmul.f32 %v2176_v16, %v2176_v16  ;;  %v2183_v23 = vld [vmem:[%s2133_s15 + $0x40] sm:$0xff]  ;;  %v2186_v24 = vld [vmem:[%s2133_s15 + $0x48] sm:$0xff]  ;;  %v2192_v26 = vld [vmem:[%s2133_s15 + $0x50] sm:$0xff]  ;;  %s2777_s8 = sld [smem:[#allocation36_spill]] }
  0x93   : > { %v2189_v25 = vld [vmem:[%s2133_s15] sm:$0xff]  ;;  %v2195_v27 = vld [vmem:[%s2133_s15 + $0x58] sm:$0xff]  ;;  %v670_v28 = vmul.f32 %v2183_v23, %v2183_v23  ;;  %v671_v29 = vmul.f32 %v2186_v24, %v2186_v24  ;;  %v672_v31 = vmul.f32 %v2192_v26, %v2192_v26  ;;  %v2211_v35 = vld [vmem:[%s2133_s15 + $0x8] sm:$0xff]  ;;  %s2778_s14 = sld [smem:[#allocation38_spill]] }
  0x94   : > { %v569_v12 = vadd.f32 %v568_v9, %v562_v6  ;;  %v2202_v30 = vld [vmem:[%s2133_s15 + $0x60] sm:$0xff]  ;;  %v662_v32 = vmul.f32 %v2189_v25, %v2189_v25  ;;  %v673_v33 = vmul.f32 %v2195_v27, %v2195_v27  ;;  %v2214_v36 = vld [vmem:[%s2133_s15 + $0x10] sm:$0xff]  ;;  %v2217_v37 = vld [vmem:[%s2133_s15 + $0x18] sm:$0xff]  ;;  %v663_v39 = vmul.f32 %v2211_v35, %v2211_v35 }
  0x95   : > { %v695_v34 = vadd.f32 %v671_v29, %v670_v28  ;;  %v2220_v38 = vld [vmem:[%s2133_s15 + $0x68] sm:$0xff]  ;;  %v664_v40 = vmul.f32 %v2214_v36, %v2214_v36  ;;  %v674_v41 = vmul.f32 %v2202_v30, %v2202_v30  ;;  %v2229_v43 = vld [vmem:[%s2133_s15 + $0x20] sm:$0xff]  ;;  %v2238_v46 = vld [vmem:[%s2133_s15 + $0x70] sm:$0xff]  ;;  %v665_v47 = vmul.f32 %v2217_v37, %v2217_v37 }
  0x96   : > { %v570_v15 = vadd.f32 %v569_v12, %v563_v8  ;;  %v2232_v44 = vld [vmem:[%s2133_s15 + $0x80] sm:$0xff]  ;;  %v2235_v45 = vld [vmem:[%s2133_s15 + $0x88] sm:$0xff]  ;;  %v686_v48 = vadd.f32 %v663_v39, %v662_v32  ;;  %v2243_v49 = vld [vmem:[%s2133_s15 + $0x90] sm:$0xff]  ;;  %v675_v53 = vmul.f32 %v2220_v38, %v2220_v38  ;;  %v666_v58 = vmul.f32 %v2229_v43, %v2229_v43  ;;  %p544_p8 = scmp.lt.s32.totalorder %s2775_s20, 1  ;;  %s1421_s30 = sshll.u32 %s2775_s20, 4 }
  0x97   : > { %v696_v42 = vadd.f32 %v695_v34, %v672_v31  ;;  %v2246_v50 = vld [vmem:[%s2133_s15 + $0x98] sm:$0xff]  ;;  %v678_v51 = vmul.f32 %v2232_v44, %v2232_v44  ;;  %v679_v52 = vmul.f32 %v2235_v45, %v2235_v45  ;;  %v2255_v55 = vld [vmem:[%s2133_s15 + $0x28] sm:$0xff]  ;;  %v680_v56 = vmul.f32 %v2243_v49, %v2243_v49  ;;  %v2265_v60 = vld [vmem:[%s2133_s15 + $0xa0] sm:$0xff]  ;;  %p546_p0 = scmp.lt.s32.totalorder %s2776_s24, 1  ;;  %s1420_s13 = sshll.u32 %s2776_s24, 3 }
  0x98   : > { %v571_v18 = vadd.f32 %v570_v15, %v564_v11  ;;  %v2260_v57 = vld [vmem:[%s2133_s15 + $0x78] sm:$0xff]  ;;  %v687_v59 = vadd.f32 %v686_v48, %v664_v40  ;;  %v676_v61 = vmul.f32 %v2238_v46, %v2238_v46  ;;  %v2270_v63 = vld [vmem:[%s2133_s15 + $0x30] sm:$0xff]  ;;  %v681_v4 = vmul.f32 %v2246_v50, %v2246_v50  ;;  %v2277_v9 = vld [vmem:[%s2133_s15 + $0xa8] sm:$0xff]  ;;  %s2346_s16 = scalar_select %p544_p8, %s2775_s20, 1 }
  0x99   : > { %v697_v54 = vadd.f32 %v696_v42, %v673_v33  ;;  %v704_v5 = vadd.f32 %v679_v52, %v678_v51  ;;  %v667_v6 = vmul.f32 %v2255_v55, %v2255_v55  ;;  %v677_v11 = vmul.f32 %v2260_v57, %v2260_v57  ;;  %v2296_v32 = vld [vmem:[%s2133_s15 + $0xb8] sm:$0xff]  ;;  %s2361_s9 = scalar_select %p546_p0, %s2776_s24, 1 }
  0x9a   : > { %v572_v20 = vadd.f32 %v571_v18, %v565_v14  ;;  %v688_v8 = vadd.f32 %v687_v59, %v665_v47  ;;  %v2282_v14 = vld [vmem:[%s2133_s15 + $0x38] sm:$0xff]  ;;  %v682_v15 = vmul.f32 %v2265_v60, %v2265_v60  ;;  %v668_v18 = vmul.f32 %v2270_v63, %v2270_v63  ;;  %s1414_s17 = sshll.u32 %s2346_s16, 1  ;;  %s1066_s26 = sadd.s32 %s1421_s30, %s1420_s13 }
  0x9b   : > { %v698_v62 = vadd.f32 %v697_v54, %v674_v41  ;;  %v669_v29 = vmul.f32 %v2282_v14, %v2282_v14  ;;  %v685_v41 = vmul.f32 %v2296_v32, %v2296_v32  ;;  %s2397_s21 = sadd.s32 %s1414_s17, %s2361_s9  ;;  %s2410_s23 = sshll.u32 %s1066_s26, 7 }
  0x9c   : > { %v573_v21 = vadd.f32 %v572_v20, %v566_v17  ;;  %v705_v17 = vadd.f32 %v704_v5, %v680_v56  ;;  %v2289_v20 = vld [vmem:[%s2133_s15 + $0xb0] sm:$0xff]  ;;  %s1415_s5 = sshll.u32 %s2397_s21, 3  ;;  %s2438_s6 = scalar_lea.hbm %s2777_s8, %s2410_s23 }
  0x9d   : > { %v699_v12 = vadd.f32 %v698_v62, %v675_v53  ;;  %v684_v34 = vmul.f32 %v2289_v20, %v2289_v20  ;;  %s1041_s24 = scalar_lea.sflag [#allocation13], %s2126_s27  ;;  %s1703_s16 = scalar_lea.vmem %s2440_s12, 1024 }
  0x9e   : > { %v574_v22 = vadd.f32 %v573_v21, %v567_v19  ;;  %v689_v19 = vadd.f32 %v688_v8, %v666_v58  ;;  %v706_v28 = vadd.f32 %v705_v17, %v681_v4  ;;  %p1704_p1 = scmp.ne.s32.totalorder %s2440_s12, %s1703_s16  ;;  %s1875_s9 = smov [#allocation12]  }
  0x9f   : > { %v700_v21 = vadd.f32 %v699_v12, %v676_v61  ;;  %s1707_s13 = sshll.u32 %s1875_s9, 4  ;;  %s1708_s13 = int_to_ptr.vmem [resolvable:$false] %s1707_s13 }
  0xa0   : > { %575 = vadd.xlane.f32.xlu0 %v574_v22  ;;  %v683_v22 = vmul.f32 %v2277_v9, %v2277_v9  ;;  %v690_v31 = vadd.f32 %v689_v19, %v667_v6  ;;  %v707_v39 = vadd.f32 %v706_v28, %v682_v15  ;;  %p1705_p2 = pnand %p1704_p1, %p1992_p9  ;;  %s1709_s30 = scalar_lea.vmem %s1708_s13, 2048 }
  0xa1   : > { %v701_v33 = vadd.f32 %v700_v21, %v677_v11  ;;  %p1710_p10 = scmp.lt.s32.totalorder %s2440_s12, %s1708_s13  ;;  %p1711_p11 = scmp.lt.s32.totalorder %s1709_s30, %s1703_s16 }
  0xa2   : > { %v691_v40 = vadd.f32 %v690_v31, %v668_v18  ;;  %v708_v42 = vadd.f32 %v707_v39, %v683_v22  ;;  %p1706_p7 = pneg %p1705_p2 }
  0xa3   : > { %702 = vadd.xlane.f32.xlu1 %v701_v33  ;;  %p1712_p13 = por %p1711_p11, %p1710_p10 }
  0xa4   : > { %v692_v47 = vadd.f32 %v691_v40, %v669_v29  ;;  %v709_v48 = vadd.f32 %v708_v42, %v684_v34 }
  0xa5   : > { %p1713_p3 = pnand %p1712_p13, %p1706_p7 }
  0xa6   : > { %693 = vadd.xlane.f32.xlu0 %v692_v47  ;;  %v710_v51 = vadd.f32 %v709_v48, %v685_v41 }
  0xa8   : > { %711 = vadd.xlane.f32.xlu1 %v710_v51 }
 0x129   : > { %v576_v52 = vpop.xlane.xlu0 %575 }
 0x12a   : > { %v577_v53 = vmax.f32 %v576_v52, 1e-24  ;;  %v724_v52 = vlaneseq }
 0x12c   : > { %1555 = vrsqrt.f32 %v577_v53  ;;  %v725_v53 = vshrl.u32 %v724_v52, 7 }
 0x12f   : > { %v694_v47 = vpop.xlane.xlu0 %693 }
 0x130   : > { %v713_v51 = vmax.f32 %v694_v47, 1e-24  ;;  %v870_v47 = vld [vmem:[%s2144_s28 + $0x50] sm:$0xff] }
 0x139   : > { %v1556_v54 = vpop.eup %1555 }
 0x13a   : > { %v579_v56 = vmul.f32 %v1556_v54, %v2150_v0  ;;  %v580_v58 = vmul.f32 %v1556_v54, %v2152_v1  ;;  %v581_v59 = vmul.f32 %v1556_v54, %v2154_v2  ;;  %v582_v61 = vmul.f32 %v1556_v54, %v2156_v3 }
 0x13b   : > { %v583_v5 = vmul.f32 %v1556_v54, %v2164_v7  ;;  %v584_v0 = vmul.f32 %v1556_v54, %v2168_v10  ;;  %v586_v10 = vmul.f32 %v1556_v54, %v2176_v16 }
 0x13c   : > { %v619_v62 = vmul.f32 %v2183_v23, %v579_v56  ;;  %v620_v4 = vmul.f32 %v2186_v24, %v580_v58  ;;  %v621_v6 = vmul.f32 %v2192_v26, %v581_v59  ;;  %v611_v11 = vmul.f32 %v2189_v25, %v579_v56 }
 0x13d   : > { %v612_v12 = vmul.f32 %v2211_v35, %v580_v58  ;;  %v622_v1 = vmul.f32 %v2195_v27, %v582_v61  ;;  %v613_v3 = vmul.f32 %v2214_v36, %v581_v59  ;;  %v627_v23 = vmul.f32 %v2232_v44, %v579_v56 }
 0x13e   : > { %v644_v8 = vadd.f32 %v620_v4, %v619_v62  ;;  %v585_v24 = vmul.f32 %v1556_v54, %v2172_v13  ;;  %v628_v7 = vmul.f32 %v2235_v45, %v580_v58  ;;  %v623_v26 = vmul.f32 %v2202_v30, %v583_v5 }
 0x13f   : > { %v635_v15 = vadd.f32 %v612_v12, %v611_v11  ;;  %v614_v25 = vmul.f32 %v2217_v37, %v582_v61  ;;  %v629_v27 = vmul.f32 %v2243_v49, %v581_v59  ;;  %v624_v36 = vmul.f32 %v2220_v38, %v584_v0 }
 0x140   : > { %v645_v2 = vadd.f32 %v644_v8, %v621_v6  ;;  %v653_v18 = vadd.f32 %v628_v7, %v627_v23  ;;  %v615_v44 = vmul.f32 %v2229_v43, %v583_v5  ;;  %v630_v13 = vmul.f32 %v2246_v50, %v582_v61 }
 0x141   : > { %v636_v35 = vadd.f32 %v635_v15, %v613_v3  ;;  %v625_v30 = vmul.f32 %v2238_v46, %v585_v24  ;;  %v616_v37 = vmul.f32 %v2255_v55, %v584_v0  ;;  %v631_v16 = vmul.f32 %v2265_v60, %v583_v5 }
 0x142   : > { %v646_v17 = vadd.f32 %v645_v2, %v622_v1  ;;  %v654_v45 = vadd.f32 %v653_v18, %v629_v27  ;;  %v626_v49 = vmul.f32 %v2260_v57, %v586_v10  ;;  %v617_v38 = vmul.f32 %v2270_v63, %v585_v24 }
 0x143   : > { %v637_v21 = vadd.f32 %v636_v35, %v614_v25  ;;  %v632_v43 = vmul.f32 %v2277_v9, %v584_v0  ;;  %v618_v39 = vmul.f32 %v2282_v14, %v586_v10  ;;  %v633_v40 = vmul.f32 %v2289_v20, %v585_v24  ;;  %v703_v9 = vpop.xlane.xlu1 %702 }
 0x144   : > { %v647_v19 = vadd.f32 %v646_v17, %v623_v26  ;;  %v655_v29 = vadd.f32 %v654_v45, %v630_v13  ;;  %v634_v57 = vmul.f32 %v2296_v32, %v586_v10  ;;  %v1873_v63 = vmov 0  }
 0x145   : > { %v638_v28 = vadd.f32 %v637_v21, %v615_v44  ;;  %1553 = vset.pattern.permute.xlu1 %v1873_v63  ;;  %1554 = vset.pattern.permute.xlu0 %v1873_v63  ;;  %v714_v48 = vmax.f32 %v703_v9, 1e-24  ;;  %v756_v54 = vand.u32 127, %v724_v52  ;;  %v731_v8 = vsub.s32 0, %v725_v53  ;;  %v868_v63 = vld [vmem:[%s2144_s28 + $0x40] sm:$0xff]  ;;  %v869_v9 = vld [vmem:[%s2144_s28 + $0x48] sm:$0xff] }
 0x146   : > { %v648_v22 = vadd.f32 %v647_v19, %v624_v36  ;;  %v656_v34 = vadd.f32 %v655_v29, %v631_v16  ;;  %v735_v11 = vsub.s32 1, %v725_v53  ;;  %v739_v12 = vsub.s32 2, %v725_v53  ;;  %v873_v52 = vld [vmem:[%s2144_s28 + $0x68] sm:$0xff] }
 0x147   : > { %v639_v33 = vadd.f32 %v638_v28, %v616_v37  ;;  %v712_v14 = vpop.xlane.xlu1 %711  ;;  %1557 = vrsqrt.f32 %v714_v48  ;;  %v759_v58 = vsub.s32 %v756_v54, %v725_v53  ;;  %v732_v23 = vrot.slane %v725_v53, %v731_v8  ;;  %v871_v48 = vld [vmem:[%s2144_s28 + $0x58] sm:$0xff] }
 0x148   : > { %v649_v31 = vadd.f32 %v648_v22, %v625_v30  ;;  %v657_v55 = vadd.f32 %v656_v34, %v632_v43  ;;  %1559 = vrsqrt.f32 %v713_v51  ;;  %v715_v20 = vmax.f32 %v712_v14, 1e-24  ;;  %v875_v54 = vld [vmem:[%s2144_s28 + $0x78] sm:$0xff] }
 0x149   : > { %v640_v46 = vadd.f32 %v639_v33, %v617_v38  ;;  %v736_v24 = vrot.slane %v725_v53, %v735_v11  ;;  %v740_v7 = vrot.slane %v725_v53, %v739_v12  ;;  %v1874_v30 = vmov 0.0  }
 0x14a   : > { %v650_v50 = vadd.f32 %v649_v31, %v626_v49  ;;  %v658_v60 = vadd.f32 %v657_v55, %v633_v40  ;;  %1561 = vrsqrt.f32 %v715_v20  ;;  %v862_v40 = vld [vmem:[%s2144_s28 + $0x10] sm:$0xff]  ;;  %v863_v55 = vld [vmem:[%s2144_s28 + $0x18] sm:$0xff]  ;;  %v872_v20 = vld [vmem:[%s2144_s28 + $0x60] sm:$0xff] }
 0x14b   : > { %v641_v41 = vadd.f32 %v640_v46, %v618_v39  ;;  %v860_v39 = vld [vmem:[%s2144_s28] sm:$0xff]  ;;  %v861_v46 = vld [vmem:[%s2144_s28 + $0x8] sm:$0xff] }
 0x14c   : > { %651 = vadd.xlane.f32.xlu1 %v650_v50  ;;  %v659_v42 = vadd.f32 %v658_v60, %v634_v57  ;;  %v865_v60 = vld [vmem:[%s2144_s28 + $0x28] sm:$0xff]  ;;  %v866_v57 = vld [vmem:[%s2144_s28 + $0x30] sm:$0xff] }
 0x14d   : > { %642 = vadd.xlane.f32.xlu0 %v641_v41  ;;  %v864_v41 = vld [vmem:[%s2144_s28 + $0x20] sm:$0xff] }
 0x151   : > { %660 = vadd.xlane.f32.xlu0 %v659_v42  ;;  %v867_v42 = vld [vmem:[%s2144_s28 + $0x38] sm:$0xff] }
 0x154   : > { %v1558_v56 = vpop.eup %1557 }
 0x155   : > { %v1560_v32 = vpop.eup %1559 }
 0x157   : > { %v1562_v6 = vpop.eup %1561 }
 0x1d5   : > { %v652_v59 = vpop.xlane.xlu1 %651 }
 0x1d6   : > { %v720_v61 = vmul.f32 %v1558_v56, %v652_v59  ;;  %v643_v62 = vpop.xlane.xlu0 %642  ;;  %v876_v56 = vld [vmem:[%s2144_s28 + $0x80] sm:$0xff] }
 0x1d7   : > { %v719_v5 = vmul.f32 %v1560_v32, %v643_v62 }
 0x1d8   : > { %v1014_v4 = vrot.slane %v720_v61, %v759_v58 }
 0x1d9   : > { %v1010_v0 = vrot.slane %v719_v5, %v759_v58  ;;  %v722_v2 = vmax.f32 %v719_v5, %v720_v61 }
 0x1da   : > { %v661_v1 = vpop.xlane.xlu0 %660 }
 0x1db   : > { %v1019_v3 = vsel %vm761_vm0, %v1014_v4, %v1010_v0  ;;  %v721_v15 = vmul.f32 %v1562_v6, %v661_v1  ;;  %v878_v4 = vld [vmem:[%s2144_s28 + $0x90] sm:$0xff]  ;;  %v880_v6 = vld [vmem:[%s2144_s28 + $0xa0] sm:$0xff]  ;;  %v881_v1 = vld [vmem:[%s2144_s28 + $0xa8] sm:$0xff] }
 0x1dd   : > { %v723_v26 = vmax.f32 %v722_v2, %v721_v15  ;;  %v1018_v17 = vrot.slane %v721_v15, %v759_v58  ;;  %v882_v2 = vld [vmem:[%s2144_s28 + $0xb0] sm:$0xff] }
 0x1df   : > { %vm728_vm3 = vcmp.eq.f32.partialorder %v721_v15, %v723_v26  ;;  %vm726_vm4 = vcmp.eq.f32.partialorder %v719_v5, %v723_v26  ;;  %vm727_vm5 = vcmp.eq.f32.partialorder %v720_v61, %v723_v26  ;;  %v1020_v25 = vsel %vm762_vm1, %v1018_v17, %v1019_v3  ;;  %v879_v5 = vld [vmem:[%s2144_s28 + $0x98] sm:$0xff] }
 0x1e0   : > { %v741_v35 = vsel %vm726_vm4, %v732_v23, 3  ;;  %v742_v10 = vsel %vm727_vm5, %v736_v24, 3  ;;  %v743_v27 = vsel %vm728_vm3, %v740_v7, 3  ;;  %v883_v3 = vld [vmem:[%s2144_s28 + $0xb8] sm:$0xff] }
 0x1e1   : > { %v745_v18 = vsel %vm744_vm2, %v741_v35, 2147483647  ;;  %v746_v36 = vsel %vm744_vm2, %v742_v10, 2147483647  ;;  %v747_v19 = vsel %vm744_vm2, %v743_v27, 2147483647 }
 0x1e2   : > { %vm748_vm6 = vcmp.lt.s32.totalorder %v745_v18, %v746_v36 }
 0x1e3   : > { %v749_v44 = vsel %vm748_vm6, %v745_v18, %v746_v36 }
 0x1e4   : > { %vm750_vm7 = vcmp.lt.s32.totalorder %v749_v44, %v747_v19 }
 0x1e5   : > { %v751_v21 = vsel %vm750_vm7, %v749_v44, %v747_v19 }
 0x1e6   : > { %753 = vperm.xlu1 %1553, %v751_v21  }
 0x261   : > { %v754_v13 = vpop.permute.xlu1 %753 }
 0x262   : > { %v760_v45 = vrot.slane %v754_v13, %v759_v58  ;;  %v877_v58 = vld [vmem:[%s2144_s28 + $0x88] sm:$0xff] }
 0x264   : > { %vm764_vm8 = vcmp.eq.s32.totalorder %v725_v53, %v760_v45  ;;  %v874_v53 = vld [vmem:[%s2144_s28 + $0x70] sm:$0xff]  ;;  %s2448_s28 = scalar_lea.vmem %s2778_s14, %s1415_s5 }
 0x265   : > { %v1416_v22 = vsel %vm764_vm8, 1.0, %v1874_v30  ;;  %v788_v30 = vld [vmem:[%s2140_s1] sm:$0xff] }
 0x266   : > { %v1022_v37 = vmul.f32 %v1416_v22, %v1020_v25  ;;  %v777_v28 = vrot.slane %v1416_v22, %v735_v11  ;;  %v770_v16 = vrot.slane %v1416_v22, %v731_v8  ;;  %v784_v31 = vrot.slane %v1416_v22, %v739_v12  ;;  %v789_v22 = vld [vmem:[%s2140_s1 + $0x8] sm:$0xff] }
 0x268   : > { %779 = vbcast.lane.b32.xlu1 %v777_v28, 256  ;;  %772 = vbcast.lane.b32.xlu0 %v770_v16, 256  ;;  %v1024_v29 = vsel %vm1023_vm9, %v1022_v37, 0.0  ;;  %v790_v37 = vld [vmem:[%s2140_s1 + $0x10] sm:$0xff] }
 0x269   : > { %v1025_v49 = vrot.slane %v1024_v29, 4 }
 0x26b   : > { %v1026_v38 = vadd.f32 %v1025_v49, %v1024_v29 }
 0x26c   : > { %786 = vbcast.lane.b32.xlu1 %v784_v31, 256  ;;  %v791_v31 = vld [vmem:[%s2140_s1 + $0x18] sm:$0xff] }
 0x26d   : > { %v1027_v33 = vrot.slane %v1026_v38, 2 }
 0x26f   : > { %v1028_v43 = vadd.f32 %v1027_v33, %v1026_v38  ;;  %v792_v38 = vld [vmem:[%s2140_s1 + $0x20] sm:$0xff]  ;;  %v793_v33 = vld [vmem:[%s2140_s1 + $0x28] sm:$0xff] }
 0x271   : > { %v1029_v34 = vrot.slane %v1028_v43, 1 }
 0x273   : > { %v1030_v50 = vadd.f32 %v1029_v34, %v1028_v43 }
 0x275   : > { %1032 = vbcast.lane.b32.xlu1 %v1030_v50, 256 }
 0x2da   : > { %v2354_v51 = vpop.permute.xlu1 %779  ;;  %v2356_v14 = vpop.permute.xlu0 %772 }
 0x2db   : > { %v884_v32 = vmul.f32 %v860_v39, %v2356_v14  ;;  %v885_v59 = vmul.f32 %v861_v46, %v2356_v14  ;;  %v886_v61 = vmul.f32 %v862_v40, %v2356_v14  ;;  %v887_v62 = vmul.f32 %v863_v55, %v2356_v14  ;;  %v794_v46 = vld [vmem:[%s2140_s1 + $0x30] sm:$0xff]  ;;  %v795_v40 = vld [vmem:[%s2140_s1 + $0x38] sm:$0xff]  ;;  %v2423_v55 = vld [vmem:[%s2140_s1 + $0x40] sm:$0xff] }
 0x2dc   : > { %v888_v8 = vmul.f32 %v864_v41, %v2356_v14  ;;  %v889_v11 = vmul.f32 %v865_v60, %v2356_v14  ;;  %v890_v12 = vmul.f32 %v866_v57, %v2356_v14  ;;  %v891_v0 = vmul.f32 %v867_v42, %v2356_v14 }
 0x2dd   : > { %v892_v15 = vmul.f32 %v868_v63, %v2354_v51  ;;  %v893_v23 = vmul.f32 %v869_v9, %v2354_v51  ;;  %v894_v24 = vmul.f32 %v870_v47, %v2354_v51  ;;  %v895_v7 = vmul.f32 %v871_v48, %v2354_v51  ;;  %v2426_v63 = vld [vmem:[%s2140_s1 + $0x48] sm:$0xff]  ;;  %v2429_v9 = vld [vmem:[%s2140_s1 + $0x50] sm:$0xff]  ;;  %v2432_v47 = vld [vmem:[%s2140_s1 + $0x58] sm:$0xff] }
 0x2de   : > { %v2390_v26 = vpop.permute.xlu1 %786  ;;  %v896_v17 = vmul.f32 %v872_v20, %v2354_v51  ;;  %v897_v25 = vmul.f32 %v873_v52, %v2354_v51  ;;  %v898_v35 = vmul.f32 %v874_v53, %v2354_v51  ;;  %v899_v10 = vmul.f32 %v875_v54, %v2354_v51  ;;  %v800_v54 = vld [vmem:[%s2140_s1 + $0x60] sm:$0xff] }
 0x2df   : > { %v900_v27 = vmul.f32 %v876_v56, %v2390_v26  ;;  %v901_v18 = vmul.f32 %v877_v58, %v2390_v26  ;;  %v902_v36 = vmul.f32 %v878_v4, %v2390_v26  ;;  %v903_v19 = vmul.f32 %v879_v5, %v2390_v26  ;;  %v801_v56 = vld [vmem:[%s2140_s1 + $0x68] sm:$0xff]  ;;  %v802_v58 = vld [vmem:[%s2140_s1 + $0x70] sm:$0xff] }
 0x2e0   : > { %v904_v44 = vmul.f32 %v880_v6, %v2390_v26  ;;  %v905_v21 = vmul.f32 %v881_v1, %v2390_v26  ;;  %v906_v13 = vmul.f32 %v882_v2, %v2390_v26  ;;  %v907_v45 = vmul.f32 %v883_v3, %v2390_v26 }
 0x2e1   : > { %v908_v28 = vadd.f32 %v892_v15, %v884_v32  ;;  %v910_v16 = vadd.f32 %v893_v23, %v885_v59  ;;  %v912_v29 = vadd.f32 %v894_v24, %v886_v61  ;;  %v914_v49 = vadd.f32 %v895_v7, %v887_v62  ;;  %v803_v32 = vld [vmem:[%s2140_s1 + $0x78] sm:$0xff]  ;;  %v804_v59 = vld [vmem:[%s2140_s1 + $0x80] sm:$0xff]  ;;  %v805_v61 = vld [vmem:[%s2140_s1 + $0x88] sm:$0xff] }
 0x2e2   : > { %v916_v43 = vadd.f32 %v896_v17, %v888_v8  ;;  %v918_v34 = vadd.f32 %v897_v25, %v889_v11  ;;  %v920_v50 = vadd.f32 %v898_v35, %v890_v12  ;;  %v922_v39 = vadd.f32 %v899_v10, %v891_v0  ;;  %v806_v8 = vld [vmem:[%s2140_s1 + $0x90] sm:$0xff]  ;;  %v807_v11 = vld [vmem:[%s2140_s1 + $0x98] sm:$0xff]  ;;  %v808_v12 = vld [vmem:[%s2140_s1 + $0xa0] sm:$0xff] }
 0x2e3   : > { %v909_v41 = vadd.f32 %v908_v28, %v900_v27  ;;  %v911_v60 = vadd.f32 %v910_v16, %v901_v18  ;;  %v913_v57 = vadd.f32 %v912_v29, %v902_v36  ;;  %v915_v42 = vadd.f32 %v914_v49, %v903_v19 }
 0x2e4   : > { %v917_v48 = vadd.f32 %v916_v43, %v904_v44  ;;  %v919_v20 = vadd.f32 %v918_v34, %v905_v21  ;;  %v921_v52 = vadd.f32 %v920_v50, %v906_v13  ;;  %v923_v53 = vadd.f32 %v922_v39, %v907_v45 }
 0x2e5   : > { %924 = vst [vmem:[%s2413_s3] sm:$0xff] %v909_v41  ;;  %925 = vst [vmem:[%s2413_s3 + $0x8] sm:$0xff] %v911_v60  ;;  %v2458_v62 = vmul.f32 %v788_v30, %v2356_v14  ;;  %v2461_v4 = vmul.f32 %v789_v22, %v2356_v14  ;;  %v2464_v5 = vmul.f32 %v790_v37, %v2356_v14 }
 0x2e6   : > { %926 = vst [vmem:[%s2413_s3 + $0x10] sm:$0xff] %v913_v57  ;;  %927 = vst [vmem:[%s2413_s3 + $0x18] sm:$0xff] %v915_v42  ;;  %v2467_v6 = vmul.f32 %v791_v31, %v2356_v14  ;;  %v2477_v0 = vmul.f32 %v792_v38, %v2356_v14  ;;  %v2480_v1 = vmul.f32 %v793_v33, %v2356_v14 }
 0x2e7   : > { %928 = vst [vmem:[%s2413_s3 + $0x20] sm:$0xff] %v917_v48  ;;  %929 = vst [vmem:[%s2413_s3 + $0x28] sm:$0xff] %v919_v20  ;;  %v2483_v2 = vmul.f32 %v794_v46, %v2356_v14  ;;  %v2486_v3 = vmul.f32 %v795_v40, %v2356_v14  ;;  %v1033_v15 = vpop.permute.xlu1 %1032 }
 0x2e8   : > { %930 = vst [vmem:[%s2413_s3 + $0x30] sm:$0xff] %v921_v52  ;;  %931 = vst [vmem:[%s2413_s3 + $0x38] sm:$0xff] %v923_v53 }
 0x2e9   : > { %1716 = shalt.err (!%p1713_p3)
}
 0x2ea   : > { %s1717_s17 = scalar_lea.hbm %s2438_s6, 1024  ;;  %s1721_s3 = scalar_lea.hbm %s2777_s8, 4096 }
 0x2eb   : > { %p1718_p4 = scmp.ne.s32.totalorder %s2438_s6, %s1717_s17  ;;  %p1722_p8 = scmp.lt.s32.totalorder %s2438_s6, %s2777_s8 }
 0x2ec   : > { %p1723_p0 = scmp.lt.s32.totalorder %s1721_s3, %s1717_s17 }
 0x2ed   : > { %p1719_p5 = pnand %p1718_p4, %p1992_p9 }
 0x2ee   : > { %p1724_p1 = por %p1723_p0, %p1722_p8 }
 0x2ef   : > { %p1720_p6 = pneg %p1719_p5 }
 0x2f1   : > { %p1725_p2 = pnand %p1724_p1, %p1720_p6 }
 0x2f3   : > { %1728 = shalt.err (!%p1725_p2)
}
 0x2f4   : > { %1451 = dma.vmem_to_hbm [thread:$0]  (%p1992_p9), %s2440_s12, 1024, %s2438_s6, %s1041_s24   ;;  %v809_v23 = vld [vmem:[%s2140_s1 + $0xa8] sm:$0xff]  ;;  %v810_v24 = vld [vmem:[%s2140_s1 + $0xb0] sm:$0xff]  ;;  %v811_v7 = vld [vmem:[%s2140_s1 + $0xb8] sm:$0xff]  ;;  %v820_v17 = vmul.f32 %v2423_v55, %v2354_v51  ;;  %v821_v25 = vmul.f32 %v2426_v63, %v2354_v51  ;;  %v822_v35 = vmul.f32 %v2429_v9, %v2354_v51  ;;  %v823_v10 = vmul.f32 %v2432_v47, %v2354_v51  ;;  %1034 = vst.msk [vmem:[%s2448_s28] sm:$0xff] %vm744_vm2, %v1033_v15 }
 0x2f5   : > { %v824_v27 = vmul.f32 %v800_v54, %v2354_v51  ;;  %v825_v18 = vmul.f32 %v801_v56, %v2354_v51  ;;  %v826_v36 = vmul.f32 %v802_v58, %v2354_v51  ;;  %v827_v19 = vmul.f32 %v803_v32, %v2354_v51  ;;  %s2537_s1 = scalar_lea.vmem [#allocation10], %s2129_s18  ;;  %s2547_s18 = scalar_lea.vmem [#allocation11], %s2117_s22 }
 0x2f6   : > { %v828_v44 = vmul.f32 %v804_v59, %v2390_v26  ;;  %v829_v21 = vmul.f32 %v805_v61, %v2390_v26  ;;  %v830_v13 = vmul.f32 %v806_v8, %v2390_v26  ;;  %v831_v45 = vmul.f32 %v807_v11, %v2390_v26  ;;  %v932_v16 = vld [vmem:[%s2537_s1] sm:$0xff]  ;;  %v933_v29 = vld [vmem:[%s2537_s1 + $0x8] sm:$0xff]  ;;  %v934_v49 = vld [vmem:[%s2537_s1 + $0x10] sm:$0xff]  ;;  %s1070_s12 = sshll.u32 %s2547_s18, 4  ;;  %s2780_s19 = sld [smem:[#allocation35_spill]]  ;;  %s2577_s12 = int_to_ptr.vmem [resolvable:$true] %s1070_s12 }
 0x2f7   : > { %v832_v30 = vmul.f32 %v808_v12, %v2390_v26  ;;  %v833_v22 = vmul.f32 %v809_v23, %v2390_v26  ;;  %v834_v37 = vmul.f32 %v810_v24, %v2390_v26  ;;  %v835_v28 = vmul.f32 %v811_v7, %v2390_v26  ;;  %v935_v34 = vld [vmem:[%s2537_s1 + $0x18] sm:$0xff]  ;;  %v936_v50 = vld [vmem:[%s2537_s1 + $0x20] sm:$0xff]  ;;  %v937_v39 = vld [vmem:[%s2537_s1 + $0x28] sm:$0xff]  ;;  %s1036_s14 = scalar_lea.sflag [#allocation4], %s2114_s29  ;;  %s1729_s28 = scalar_lea.vmem %s2577_s12, 1024 }
 0x2f8   : > { %v836_v31 = vadd.f32 %v820_v17, %v2458_v62  ;;  %v838_v38 = vadd.f32 %v821_v25, %v2461_v4  ;;  %v840_v33 = vadd.f32 %v822_v35, %v2464_v5  ;;  %v842_v43 = vadd.f32 %v823_v10, %v2467_v6  ;;  %v938_v60 = vld [vmem:[%s2537_s1 + $0x30] sm:$0xff]  ;;  %v939_v57 = vld [vmem:[%s2537_s1 + $0x38] sm:$0xff]  ;;  %v2560_v42 = vld [vmem:[%s2537_s1 + $0x40] sm:$0xff]  ;;  %p1730_p7 = scmp.ne.s32.totalorder %s2577_s12, %s1729_s28  ;;  %s1876_s16 = smov [#allocation11]  }
 0x2f9   : > { %v844_v46 = vadd.f32 %v824_v27, %v2477_v0  ;;  %v846_v40 = vadd.f32 %v825_v18, %v2480_v1  ;;  %v848_v55 = vadd.f32 %v826_v36, %v2483_v2  ;;  %v850_v41 = vadd.f32 %v827_v19, %v2486_v3  ;;  %v2563_v20 = vld [vmem:[%s2537_s1 + $0x48] sm:$0xff]  ;;  %v2566_v52 = vld [vmem:[%s2537_s1 + $0x50] sm:$0xff]  ;;  %v2569_v53 = vld [vmem:[%s2537_s1 + $0x58] sm:$0xff]  ;;  %s1733_s9 = sshll.u32 %s1876_s16, 4  ;;  %s1734_s9 = int_to_ptr.vmem [resolvable:$false] %s1733_s9 }
 0x2fa   : > { %v837_v63 = vadd.f32 %v836_v31, %v828_v44  ;;  %v839_v9 = vadd.f32 %v838_v38, %v829_v21  ;;  %v841_v47 = vadd.f32 %v840_v33, %v830_v13  ;;  %v843_v48 = vadd.f32 %v842_v43, %v831_v45  ;;  %v944_v59 = vld [vmem:[%s2537_s1 + $0x60] sm:$0xff]  ;;  %v945_v61 = vld [vmem:[%s2537_s1 + $0x68] sm:$0xff]  ;;  %v946_v62 = vld [vmem:[%s2537_s1 + $0x70] sm:$0xff]  ;;  %p1731_p10 = pnand %p1730_p7, %p1992_p9  ;;  %s1735_s13 = scalar_lea.vmem %s1734_s9, 2048 }
 0x2fb   : > { %v845_v54 = vadd.f32 %v844_v46, %v832_v30  ;;  %v847_v56 = vadd.f32 %v846_v40, %v833_v22  ;;  %v849_v58 = vadd.f32 %v848_v55, %v834_v37  ;;  %v851_v32 = vadd.f32 %v850_v41, %v835_v28  ;;  %v947_v4 = vld [vmem:[%s2537_s1 + $0x78] sm:$0xff]  ;;  %v948_v5 = vld [vmem:[%s2537_s1 + $0x80] sm:$0xff]  ;;  %v949_v6 = vld [vmem:[%s2537_s1 + $0x88] sm:$0xff]  ;;  %p1736_p13 = scmp.lt.s32.totalorder %s2577_s12, %s1734_s9  ;;  %p1737_p3 = scmp.lt.s32.totalorder %s1735_s13, %s1729_s28 }
 0x2fc   : > { %s2575_s15 = scalar_lea.hbm %s2780_s19, %s2410_s23  ;;  %852 = vst [vmem:[%s2547_s18] sm:$0xff] %v837_v63  ;;  %853 = vst [vmem:[%s2547_s18 + $0x8] sm:$0xff] %v839_v9  ;;  %v956_v8 = vmul.f32 %v932_v16, %v2356_v14  ;;  %v957_v11 = vmul.f32 %v933_v29, %v2356_v14  ;;  %v958_v12 = vmul.f32 %v934_v49, %v2356_v14  ;;  %v950_v1 = vld [vmem:[%s2537_s1 + $0x90] sm:$0xff]  ;;  %v951_v2 = vld [vmem:[%s2537_s1 + $0x98] sm:$0xff]  ;;  %p1732_p11 = pneg %p1731_p10 }
 0x2fd   : > { %854 = vst [vmem:[%s2547_s18 + $0x10] sm:$0xff] %v841_v47  ;;  %855 = vst [vmem:[%s2547_s18 + $0x18] sm:$0xff] %v843_v48  ;;  %v959_v0 = vmul.f32 %v935_v34, %v2356_v14  ;;  %v952_v3 = vld [vmem:[%s2537_s1 + $0xa0] sm:$0xff]  ;;  %v960_v15 = vmul.f32 %v936_v50, %v2356_v14  ;;  %v961_v23 = vmul.f32 %v937_v39, %v2356_v14  ;;  %p1738_p4 = por %p1737_p3, %p1736_p13 }
 0x2fe   : > { %856 = vst [vmem:[%s2547_s18 + $0x20] sm:$0xff] %v845_v54  ;;  %857 = vst [vmem:[%s2547_s18 + $0x28] sm:$0xff] %v847_v56  ;;  %v962_v24 = vmul.f32 %v938_v60, %v2356_v14  ;;  %v963_v7 = vmul.f32 %v939_v57, %v2356_v14 }
 0x2ff   : > { %858 = vst [vmem:[%s2547_s18 + $0x30] sm:$0xff] %v849_v58  ;;  %859 = vst [vmem:[%s2547_s18 + $0x38] sm:$0xff] %v851_v32  ;;  %p1739_p5 = pnand %p1738_p4, %p1732_p11 }
 0x301   : > { %1742 = shalt.err (!%p1739_p5)
}
 0x302   : > { %s1743_s30 = scalar_lea.hbm %s2575_s15, 1024  ;;  %s1747_s26 = scalar_lea.hbm %s2780_s19, 4096 }
 0x303   : > { %p1744_p6 = scmp.ne.s32.totalorder %s2575_s15, %s1743_s30  ;;  %p1748_p1 = scmp.lt.s32.totalorder %s2575_s15, %s2780_s19 }
 0x304   : > { %p1749_p2 = scmp.lt.s32.totalorder %s1747_s26, %s1743_s30 }
 0x305   : > { %p1745_p8 = pnand %p1744_p6, %p1992_p9 }
 0x306   : > { %p1750_p7 = por %p1749_p2, %p1748_p1 }
 0x307   : > { %p1746_p0 = pneg %p1745_p8 }
 0x309   : > { %p1751_p10 = pnand %p1750_p7, %p1746_p0 }
 0x30b   : > { %1754 = shalt.err (!%p1751_p10)
}
 0x30c   : > { %1450 = dma.vmem_to_hbm [thread:$0]  (%p1992_p9), %s2577_s12, 1024, %s2575_s15, %s1036_s14   ;;  %v953_v14 = vld [vmem:[%s2537_s1 + $0xa8] sm:$0xff]  ;;  %v954_v17 = vld [vmem:[%s2537_s1 + $0xb0] sm:$0xff]  ;;  %v955_v25 = vld [vmem:[%s2537_s1 + $0xb8] sm:$0xff]  ;;  %v964_v35 = vmul.f32 %v2560_v42, %v2354_v51  ;;  %v965_v10 = vmul.f32 %v2563_v20, %v2354_v51  ;;  %v966_v27 = vmul.f32 %v2566_v52, %v2354_v51  ;;  %v967_v18 = vmul.f32 %v2569_v53, %v2354_v51 }
 0x30d   : > { %v968_v36 = vmul.f32 %v944_v59, %v2354_v51  ;;  %v969_v19 = vmul.f32 %v945_v61, %v2354_v51  ;;  %v970_v44 = vmul.f32 %v946_v62, %v2354_v51  ;;  %v971_v21 = vmul.f32 %v947_v4, %v2354_v51  ;;  %s533_s5 = scalar_lea.vmem [#allocation14], %s2117_s22  ;;  %s2781_s12 = sld [smem:[#allocation37_spill]] }
 0x30e   : > { %v972_v13 = vmul.f32 %v948_v5, %v2390_v26  ;;  %v973_v45 = vmul.f32 %v949_v6, %v2390_v26  ;;  %v974_v30 = vmul.f32 %v950_v1, %v2390_v26  ;;  %v975_v22 = vmul.f32 %v951_v2, %v2390_v26  ;;  %s1102_s7 = sshll.u32 %s533_s5, 4  ;;  %s2655_s7 = int_to_ptr.vmem [resolvable:$true] %s1102_s7 }
 0x30f   : > { %v976_v37 = vmul.f32 %v952_v3, %v2390_v26  ;;  %v977_v28 = vmul.f32 %v953_v14, %v2390_v26  ;;  %v978_v16 = vmul.f32 %v954_v17, %v2390_v26  ;;  %v979_v29 = vmul.f32 %v955_v25, %v2390_v26  ;;  %s1755_s22 = scalar_lea.vmem %s2655_s7, 1024 }
 0x310   : > { %v980_v49 = vadd.f32 %v964_v35, %v956_v8  ;;  %v982_v31 = vadd.f32 %v965_v10, %v957_v11  ;;  %v984_v51 = vadd.f32 %v966_v27, %v958_v12  ;;  %v986_v38 = vadd.f32 %v967_v18, %v959_v0  ;;  %p1756_p11 = scmp.ne.s32.totalorder %s2655_s7, %s1755_s22 }
 0x311   : > { %v988_v33 = vadd.f32 %v968_v36, %v960_v15  ;;  %v990_v43 = vadd.f32 %v969_v19, %v961_v23  ;;  %v992_v34 = vadd.f32 %v970_v44, %v962_v24  ;;  %v994_v50 = vadd.f32 %v971_v21, %v963_v7 }
 0x312   : > { %v981_v39 = vadd.f32 %v980_v49, %v972_v13  ;;  %v983_v46 = vadd.f32 %v982_v31, %v973_v45  ;;  %v985_v40 = vadd.f32 %v984_v51, %v974_v30  ;;  %v987_v55 = vadd.f32 %v986_v38, %v975_v22  ;;  %p1757_p13 = pnand %p1756_p11, %p1992_p9 }
 0x313   : > { %s2782_s25 = smov %s2781_s12  ;;  %s2653_s6 = scalar_lea.hbm %s2781_s12, %s2410_s23  ;;  %v989_v26 = vadd.f32 %v988_v33, %v976_v37  ;;  %v991_v41 = vadd.f32 %v990_v43, %v977_v28  ;;  %v993_v60 = vadd.f32 %v992_v34, %v978_v16  ;;  %v995_v57 = vadd.f32 %v994_v50, %v979_v29 }
 0x314   : > { %996 = vst [vmem:[%s533_s5] sm:$0xff] %v981_v39  ;;  %997 = vst [vmem:[%s533_s5 + $0x8] sm:$0xff] %v983_v46  ;;  %p1758_p3 = pneg %p1757_p13  ;;  %s1877_s23 = smov [#allocation14]  }
 0x315   : > { %998 = vst [vmem:[%s533_s5 + $0x10] sm:$0xff] %v985_v40  ;;  %999 = vst [vmem:[%s533_s5 + $0x18] sm:$0xff] %v987_v55  ;;  %s1759_s15 = sshll.u32 %s1877_s23, 4  ;;  %s1760_s15 = int_to_ptr.vmem [resolvable:$false] %s1759_s15 }
 0x316   : > { %1000 = vst [vmem:[%s533_s5 + $0x20] sm:$0xff] %v989_v26  ;;  %1001 = vst [vmem:[%s533_s5 + $0x28] sm:$0xff] %v991_v41  ;;  %s1761_s14 = scalar_lea.vmem %s1760_s15, 2048  ;;  %p1762_p4 = scmp.lt.s32.totalorder %s2655_s7, %s1760_s15 }
 0x317   : > { %1002 = vst [vmem:[%s533_s5 + $0x30] sm:$0xff] %v993_v60  ;;  %1003 = vst [vmem:[%s533_s5 + $0x38] sm:$0xff] %v995_v57  ;;  %p1763_p5 = scmp.lt.s32.totalorder %s1761_s14, %s1755_s22 }
 0x319   : > { %p1764_p6 = por %p1763_p5, %p1762_p4 }
 0x31b   : > { %p1765_p8 = pnand %p1764_p6, %p1758_p3 }
 0x31d   : > { %1768 = shalt.err (!%p1765_p8)
}
 0x31e   : > { %s1769_s28 = scalar_lea.hbm %s2653_s6, 1024  ;;  %s1773_s13 = scalar_lea.hbm %s2782_s25, 4096 }
 0x31f   : > { %p1770_p0 = scmp.ne.s32.totalorder %s2653_s6, %s1769_s28  ;;  %p1774_p7 = scmp.lt.s32.totalorder %s2653_s6, %s2782_s25 }
 0x320   : > { %p1775_p10 = scmp.lt.s32.totalorder %s1773_s13, %s1769_s28 }
 0x321   : > { %p1771_p1 = pnand %p1770_p0, %p1992_p9 }
 0x322   : > { %p1776_p11 = por %p1775_p10, %p1774_p7 }
 0x323   : > { %p1772_p2 = pneg %p1771_p1 }
 0x325   : > { %p1777_p13 = pnand %p1776_p11, %p1772_p2 }
 0x327   : > { %1780 = shalt.err (!%p1777_p13)
}
 0x328   : > { %1452 = dma.vmem_to_hbm [thread:$0]  (%p1992_p9), %s2655_s7, 1024, %s2653_s6, %s1041_s24  }
 0x329 PF: > { %s2783_s17 = sld [smem:[#allocation25_spill]] }
 0x32a   : > { %s2784_s26 = sld [smem:[#allocation20_spill]] }
 0x32f   : > { %p1483_p3 = scmp.ge.s32.totalorder %s2783_s17, 2 }
 0x330   : > { %s1117_s3 = sand.u32 1, %s2784_s26  }
 0x331   : > { %p1473_p4 = pnand %p1483_p3, %p2000_p12  ;;  %s1118_s5 = scalar_lea.sflag [#allocation4], %s1117_s3 }
 0x333   : > { %p1474_p5 = pneg %p1473_p4 }
 0x335   : > { %1826 = dma.done.wait (%p1474_p5), %s1118_s5, 1024  }
 0x336   : > { %1828 = vsyncadd (%p1474_p5), %s1118_s5, 4294966272  ;;  %s2786_s1 = sadd.s32 4294967294, %s2783_s17  }
 0x337   : > { %s1126_s20 = sand.u32 1, %s2786_s1  }
 0x338   : > { %s1127_s18 = scalar_lea.sflag [#allocation13], %s1126_s20 }
 0x339   : > { %1830 = dma.done.wait (%p1474_p5), %s1127_s18, 2048  }
 0x33a   : > { %1832 = vsyncadd (%p1474_p5), %s1127_s18, 4294965248  ;;  %s34_s12 = sadd.s32 1, %s2783_s17   ;;  %s2787_s27 = sld [smem:[#allocation21_spill]] }
 0x33b   : > { %p31_p9 = scmp.ge.s32.totalorder %s34_s12, 6   ;;  %s2788_s28 = sld [smem:[#allocation22_spill]] }
 0x33c   : > { %s2789_s29 = sld [smem:[#allocation32_spill]]  ;;  %s2792_s30 = smov %s1855_s10 }
 0x33d   : > { %s2790_s24 = sld [smem:[#allocation27_spill]]  ;;  %s2793_s9 = smov %s1859_s11 }
 0x33e   : > { %s2791_s7 = sld [smem:[#allocation28_spill]] }
 0x340   :  { %33 = sbr.rel (!%p31_p9) target bundleno = 20 (0x14), region = 177 }
 0x343   : > { %s2794_s10 = smov %s2790_s24 }
 0x344   : > { %s2795_s11 = smov %s2791_s7 }
 0x345   :  { %1152 = vsyncpa [#allocation3], 1 }
 0x346   :  { %1154 = vsyncpa [#allocation3 + $0x1], 1 }
 0x347   :  { %1155 = vsyncpa [#allocation6], 1 }
 0x348   :  { %1157 = vsyncpa [#allocation6 + $0x1], 1 }
 0x349   :  { %1158 = vsyncpa [#allocation9], 1 }
 0x34a   :  { %1160 = vsyncpa [#allocation9 + $0x1], 1 }
 0x34b   :  { %1161 = vsyncpa [#allocation4], 1 }
 0x34c   :  { %1163 = vsyncpa [#allocation4 + $0x1], 1 }
 0x34d   :  { %1164 = vsyncpa [#allocation13], 1 }
 0x34e   :  { %1166 = vsyncpa [#allocation13 + $0x1], 1 }

</bundles_post_ra>
